<compile_context>
chip_gen: v7x
topology: tpu7x:2x2x1
jax: 0.10.0
libtpu: 0.0.40
codegen_flags: <defaults>
</compile_context>

<pallas_src>
import jax
import jax.numpy as jnp
from jax.experimental import pallas as pl
from jax.experimental.pallas import tpu as pltpu

# Make XLA-side f32 matmuls (param packing + reference) true f32 so they match
# the kernel's f32 MXU accumulation.
jax.config.update("jax_default_matmul_precision", "highest")


# ---------------------------------------------------------------------------
# Pallas kernel: fused 2-layer LSTM over the full sequence (flipped layout).
# ---------------------------------------------------------------------------
def _lstm2_kernel(tok_ref, proj_ref, w1_ref, whh1t_ref, b1_ref, out_ref):
    """Fused 2-layer LSTM, whole sequence in one invocation.

    tok_ref:   (B, T)    int32 tokens, SMEM.
    proj_ref:  (V, 4H)   pre-gate table:  E @ W_ih0^T + b0   (VMEM).
    w1_ref:    (H, 8H)   [W_hh0^T | W_ih1^T]                 (VMEM).
    whh1t_ref: (H, 4H)   W_hh1^T                             (VMEM).
    b1_ref:    (1, 4H)   b_ih1 + b_hh1                       (VMEM).
    out_ref:   (B, T*H)  layer-2 hidden states, time-major along lanes.
    """
    B, T = tok_ref.shape
    H = whh1t_ref.shape[0]
    FH = 4 * H

    # Hoist weight / bias reads out of the time loop (vreg-resident).
    w1 = w1_ref[...]                                   # (H, 8H)
    whh1t = whh1t_ref[...]                             # (H, 4H)
    b1 = b1_ref[...]                                   # (1, 4H) -> broadcasts

    def cell(z, c_prev):
        # PyTorch gate order along the lane axis: i, f, g, o.
        # Batched nonlinearities: 2 EUP pushes over full-width z, 1 for tanh(c).
        s = jax.nn.sigmoid(z)                          # i, f, o live here
        u = jnp.tanh(z)                                # g lives here
        i = s[:, 0 * H:1 * H]
        f = s[:, 1 * H:2 * H]
        g = u[:, 2 * H:3 * H]
        o = s[:, 3 * H:4 * H]
        c = f * c_prev + i * g
        h = o * jnp.tanh(c)
        return h, c

    zh = jnp.zeros((B, H), jnp.float32)
    h1, c1, h2, c2 = zh, zh, zh, zh
    rec1 = jnp.zeros((B, FH), jnp.float32)             # W_hh0 @ h1_{t-1} term

    outs = []
    # T is small and static: fully unrolled, static indices everywhere; both
    # layers interleaved per step.
    for t in range(T):
        # In-kernel pre-gate gather: dynamic row slice per (b, t) token.
        rows = [proj_ref[pl.ds(tok_ref[b, t], 1), :] for b in range(B)]
        gx_t = jnp.concatenate(rows, axis=0)           # (B, 4H)

        # Layer 1: input projection was pre-folded into proj_table.
        z1 = gx_t + rec1
        h1, c1 = cell(z1, c1)

        # One full-lane (B, 8H) dot drives layer-1's next-step recurrence AND
        # layer-2's input projection; the h2 dot only needs h2_{t-1} so it is
        # off the serial chain.
        big = jnp.dot(h1, w1, preferred_element_type=jnp.float32)       # (B, 8H)
        rec2 = jnp.dot(h2, whh1t, preferred_element_type=jnp.float32)   # (B, 4H)
        rec1 = big[:, :FH]                             # for z1 at t+1
        z2 = big[:, FH:] + rec2 + b1
        h2, c2 = cell(z2, c2)

        outs.append(h2)

    # Single lane-dense (B, T*H) store; one clean HBM writeback at kernel end.
    out_ref[...] = jnp.concatenate(outs, axis=1)


# ---------------------------------------------------------------------------
# One-time parameter packing (hoisted out of the per-call forward).
# ---------------------------------------------------------------------------
def pack_params(params):
    emb = params["embedding"]                                # (V, D)
    w_ih0, w_hh0 = params["w_ih_0"], params["w_hh_0"]        # (4H, D), (4H, H)
    w_ih1, w_hh1 = params["w_ih_1"], params["w_hh_1"]        # (4H, H), (4H, H)
    b0 = params["b_ih_0"] + params["b_hh_0"]                 # (4H,)
    b1 = params["b_ih_1"] + params["b_hh_1"]                 # (4H,)

    # Fold [embedding lookup + layer-1 input projection + bias] into one table.
    # (padding_idx=0: row 0 of emb is zero, so its pre-gate is exactly b0 --
    #  identical to PyTorch.)
    proj_table = jnp.dot(emb, w_ih0.T) + b0                  # (V, 4H)
    w1 = jnp.concatenate([w_hh0.T, w_ih1.T], axis=1)         # (H, 8H)
    whh1t = w_hh1.T                                          # (H, 4H)
    return {
        "proj_table": proj_table.astype(jnp.float32),
        "w1": w1.astype(jnp.float32),
        "whh1t": whh1t.astype(jnp.float32),
        "b1": b1[None, :].astype(jnp.float32),               # (1, 4H)
    }


# ---------------------------------------------------------------------------
# SimpleLM forward: everything after the (one-time) packing is the kernel.
# ---------------------------------------------------------------------------
@jax.jit
def simple_lm_forward(tokens, packed):
    # tokens: (B, T) int32  (or (B, T, 1) -> squeezed, like the PyTorch module)
    if tokens.ndim == 3:
        tokens = tokens[:, :, 0]
    B, T = tokens.shape
    H = packed["whh1t"].shape[0]

    out_flat = pl.pallas_call(
        _lstm2_kernel,
        out_shape=jax.ShapeDtypeStruct((B, T * H), jnp.float32),
        in_specs=[
            pl.BlockSpec(memory_space=pltpu.MemorySpace.SMEM),   # tokens
            pl.BlockSpec(memory_space=pltpu.MemorySpace.VMEM),   # proj_table
            pl.BlockSpec(memory_space=pltpu.MemorySpace.VMEM),   # w1
            pl.BlockSpec(memory_space=pltpu.MemorySpace.VMEM),   # whh1t
            pl.BlockSpec(memory_space=pltpu.MemorySpace.VMEM),   # b1
        ],
        out_specs=pl.BlockSpec(memory_space=pltpu.MemorySpace.VMEM),
    )(tokens.astype(jnp.int32), packed["proj_table"], packed["w1"],
      packed["whh1t"], packed["b1"])                             # (B, T*H)

    # dropout(p=0.2) between LSTM layers is identity in eval mode.
    return out_flat.reshape(B, T, H)                             # (B, T, H)


def init_params(key, vocab_size, n_factors, embed_dim):
    ks = jax.random.split(key, 9)
    s = 1.0 / float(n_factors) ** 0.5

    def u(k, shape):
        return jax.random.uniform(k, shape, jnp.float32, -s, s)

    emb = jax.random.normal(ks[0], (vocab_size, embed_dim), jnp.float32)
    emb = emb.at[0].set(0.0)  # padding_idx=0

    # PyTorch-native layouts: weight_ih (4H, in), weight_hh (4H, H), biases (4H,).
    return {
        "embedding": emb,
        "w_ih_0": u(ks[1], (4 * n_factors, embed_dim)),
        "w_hh_0": u(ks[2], (4 * n_factors, n_factors)),
        "b_ih_0": u(ks[3], (4 * n_factors,)),
        "b_hh_0": u(ks[4], (4 * n_factors,)),
        "w_ih_1": u(ks[5], (4 * n_factors, n_factors)),
        "w_hh_1": u(ks[6], (4 * n_factors, n_factors)),
        "b_ih_1": u(ks[7], (4 * n_factors,)),
        "b_hh_1": u(ks[8], (4 * n_factors,)),
    }


# ---------------------------------------------------------------------------
# Pure-JAX reference (PyTorch LSTM eval semantics) for a correctness check.
# ---------------------------------------------------------------------------
def _lstm_layer_ref(x_tbd, w_ih, w_hh, b_ih, b_hh):
    T, B, _ = x_tbd.shape
    H = w_hh.shape[1]
    bias = b_ih + b_hh

    def step(carry, x_t):
        h, c = carry
        z = x_t @ w_ih.T + h @ w_hh.T + bias
        i = jax.nn.sigmoid(z[:, 0 * H:1 * H])
        f = jax.nn.sigmoid(z[:, 1 * H:2 * H])
        g = jnp.tanh(z[:, 2 * H:3 * H])
        o = jax.nn.sigmoid(z[:, 3 * H:4 * H])
        c = f * c + i * g
        h = o * jnp.tanh(c)
        return (h, c), h

    init = (jnp.zeros((B, H), jnp.float32), jnp.zeros((B, H), jnp.float32))
    _, ys = jax.lax.scan(step, init, x_tbd)
    return ys


@jax.jit
def simple_lm_ref(tokens, params):
    emb = jnp.take(params["embedding"], tokens, axis=0)     # (B, T, D)
    x = jnp.transpose(emb, (1, 0, 2)).astype(jnp.float32)   # (T, B, D)
    h1 = _lstm_layer_ref(x, params["w_ih_0"], params["w_hh_0"],
                         params["b_ih_0"], params["b_hh_0"])
    h2 = _lstm_layer_ref(h1, params["w_ih_1"], params["w_hh_1"],
                         params["b_ih_1"], params["b_hh_1"])
    return jnp.transpose(h2, (1, 0, 2))                     # (B, T, H)


if __name__ == "__main__":
    VOCAB, N_FACTORS, EMBED_DIM = 32, 16, 32
    B, T = 2, 8

    key = jax.random.PRNGKey(0)
    k_tok, k_param = jax.random.split(key)

    params = init_params(k_param, VOCAB, N_FACTORS, EMBED_DIM)
    packed = pack_params(params)          # one-time packing, outside the forward
    tokens = jax.random.randint(k_tok, (B, T), 0, VOCAB, dtype=jnp.int32)

    out = jax.block_until_ready(simple_lm_forward(tokens, packed))
    assert out.shape == (B, T, N_FACTORS), out.shape

    ref = jax.block_until_ready(simple_lm_ref(tokens, params))
    err = float(jnp.max(jnp.abs(out - ref)))
    assert err < 1e-4, err

    print("KERNEL_OK")
</pallas_src>

<mosaic_0001>
module attributes {stable_mosaic.version = 11 : i64} {
  func.func @_lstm2_kernel(%arg0: memref<2x8xi32, #tpu.memory_space<smem>>, %arg1: memref<32x64xf32, #tpu.memory_space<vmem>>, %arg2: memref<16x128xf32, #tpu.memory_space<vmem>>, %arg3: memref<16x64xf32, #tpu.memory_space<vmem>>, %arg4: memref<1x64xf32, #tpu.memory_space<vmem>>, %arg5: memref<2x128xf32, #tpu.memory_space<vmem>>) attributes {dimension_semantics = [], scalar_prefetch = 0 : i64, scratch_operands = 0 : i64, tpu.core_type = #tpu.core_type<tc>} {
    %c0 = arith.constant 0 : index
    %c0_0 = arith.constant 0 : index
    %0 = vector.load %arg2[%c0, %c0_0] : memref<16x128xf32, #tpu.memory_space<vmem>>, vector<16x128xf32>
    %c0_1 = arith.constant 0 : index
    %c0_2 = arith.constant 0 : index
    %1 = vector.load %arg3[%c0_1, %c0_2] : memref<16x64xf32, #tpu.memory_space<vmem>>, vector<16x64xf32>
    %c0_3 = arith.constant 0 : index
    %c0_4 = arith.constant 0 : index
    %2 = vector.load %arg4[%c0_3, %c0_4] : memref<1x64xf32, #tpu.memory_space<vmem>>, vector<1x64xf32>
    %cst = arith.constant 0.000000e+00 : f32
    %3 = vector.broadcast %cst : f32 to vector<2x16xf32>
    %cst_5 = arith.constant 0.000000e+00 : f32
    %4 = vector.broadcast %cst_5 : f32 to vector<2x64xf32>
    %c0_6 = arith.constant 0 : index
    %c0_7 = arith.constant 0 : index
    %5 = memref.load %arg0[%c0_6, %c0_7] : memref<2x8xi32, #tpu.memory_space<smem>>
    %6 = arith.index_cast %5 : i32 to index
    %c0_8 = arith.constant 0 : index
    %7 = vector.load %arg1[%6, %c0_8] : memref<32x64xf32, #tpu.memory_space<vmem>>, vector<1x64xf32>
    %c1 = arith.constant 1 : index
    %c0_9 = arith.constant 0 : index
    %8 = memref.load %arg0[%c1, %c0_9] : memref<2x8xi32, #tpu.memory_space<smem>>
    %9 = arith.index_cast %8 : i32 to index
    %c0_10 = arith.constant 0 : index
    %10 = vector.load %arg1[%9, %c0_10] : memref<32x64xf32, #tpu.memory_space<vmem>>, vector<1x64xf32>
    %11 = tpu.concatenate %7, %10 in 0 : vector<1x64xf32>, vector<1x64xf32> -> vector<2x64xf32>
    %12 = arith.addf %11, %4 : vector<2x64xf32>
    %13 = arith.negf %12 : vector<2x64xf32>
    %14 = math.exp %13 : vector<2x64xf32>
    %cst_11 = arith.constant 1.000000e+00 : f32
    %15 = vector.broadcast %cst_11 : f32 to vector<2x64xf32>
    %16 = arith.addf %15, %14 : vector<2x64xf32>
    %17 = arith.divf %15, %16 : vector<2x64xf32>
    %18 = math.tanh %12 : vector<2x64xf32>
    %19 = vector.extract_strided_slice %17 {offsets = [0, 0], sizes = [2, 16], strides = [1, 1]} : vector<2x64xf32> to vector<2x16xf32>
    %20 = vector.extract_strided_slice %17 {offsets = [0, 16], sizes = [2, 16], strides = [1, 1]} : vector<2x64xf32> to vector<2x16xf32>
    %21 = vector.extract_strided_slice %18 {offsets = [0, 32], sizes = [2, 16], strides = [1, 1]} : vector<2x64xf32> to vector<2x16xf32>
    %22 = vector.extract_strided_slice %17 {offsets = [0, 48], sizes = [2, 16], strides = [1, 1]} : vector<2x64xf32> to vector<2x16xf32>
    %23 = arith.mulf %20, %3 : vector<2x16xf32>
    %24 = arith.mulf %19, %21 : vector<2x16xf32>
    %25 = arith.addf %23, %24 : vector<2x16xf32>
    %26 = math.tanh %25 : vector<2x16xf32>
    %27 = arith.mulf %22, %26 : vector<2x16xf32>
    %cst_12 = arith.constant dense<0.000000e+00> : vector<2x128xf32>
    %28 = tpu.matmul %27, %0, %cst_12 {dimension_numbers = #tpu.dot_dimension_numbers<[1], [0], [0], [1], [0, 0, 1, 1], [], []>, precision = #tpu.contract_precision<fp32>} : vector<2x16xf32>, vector<16x128xf32>, vector<2x128xf32> -> vector<2x128xf32>
    %cst_13 = arith.constant dense<0.000000e+00> : vector<2x64xf32>
    %29 = tpu.matmul %3, %1, %cst_13 {dimension_numbers = #tpu.dot_dimension_numbers<[1], [0], [0], [1], [0, 0, 1, 1], [], []>, precision = #tpu.contract_precision<fp32>} : vector<2x16xf32>, vector<16x64xf32>, vector<2x64xf32> -> vector<2x64xf32>
    %30 = vector.extract_strided_slice %28 {offsets = [0, 0], sizes = [2, 64], strides = [1, 1]} : vector<2x128xf32> to vector<2x64xf32>
    %31 = vector.extract_strided_slice %28 {offsets = [0, 64], sizes = [2, 64], strides = [1, 1]} : vector<2x128xf32> to vector<2x64xf32>
    %32 = arith.addf %31, %29 : vector<2x64xf32>
    %33 = vector.broadcast %2 : vector<1x64xf32> to vector<2x64xf32>
    %34 = arith.addf %32, %33 : vector<2x64xf32>
    %35 = arith.negf %34 : vector<2x64xf32>
    %36 = math.exp %35 : vector<2x64xf32>
    %cst_14 = arith.constant 1.000000e+00 : f32
    %37 = vector.broadcast %cst_14 : f32 to vector<2x64xf32>
    %38 = arith.addf %37, %36 : vector<2x64xf32>
    %39 = arith.divf %37, %38 : vector<2x64xf32>
    %40 = math.tanh %34 : vector<2x64xf32>
    %41 = vector.extract_strided_slice %39 {offsets = [0, 0], sizes = [2, 16], strides = [1, 1]} : vector<2x64xf32> to vector<2x16xf32>
    %42 = vector.extract_strided_slice %39 {offsets = [0, 16], sizes = [2, 16], strides = [1, 1]} : vector<2x64xf32> to vector<2x16xf32>
    %43 = vector.extract_strided_slice %40 {offsets = [0, 32], sizes = [2, 16], strides = [1, 1]} : vector<2x64xf32> to vector<2x16xf32>
    %44 = vector.extract_strided_slice %39 {offsets = [0, 48], sizes = [2, 16], strides = [1, 1]} : vector<2x64xf32> to vector<2x16xf32>
    %45 = arith.mulf %42, %3 : vector<2x16xf32>
    %46 = arith.mulf %41, %43 : vector<2x16xf32>
    %47 = arith.addf %45, %46 : vector<2x16xf32>
    %48 = math.tanh %47 : vector<2x16xf32>
    %49 = arith.mulf %44, %48 : vector<2x16xf32>
    %c0_15 = arith.constant 0 : index
    %c1_16 = arith.constant 1 : index
    %50 = memref.load %arg0[%c0_15, %c1_16] : memref<2x8xi32, #tpu.memory_space<smem>>
    %51 = arith.index_cast %50 : i32 to index
    %c0_17 = arith.constant 0 : index
    %52 = vector.load %arg1[%51, %c0_17] : memref<32x64xf32, #tpu.memory_space<vmem>>, vector<1x64xf32>
    %c1_18 = arith.constant 1 : index
    %c1_19 = arith.constant 1 : index
    %53 = memref.load %arg0[%c1_18, %c1_19] : memref<2x8xi32, #tpu.memory_space<smem>>
    %54 = arith.index_cast %53 : i32 to index
    %c0_20 = arith.constant 0 : index
    %55 = vector.load %arg1[%54, %c0_20] : memref<32x64xf32, #tpu.memory_space<vmem>>, vector<1x64xf32>
    %56 = tpu.concatenate %52, %55 in 0 : vector<1x64xf32>, vector<1x64xf32> -> vector<2x64xf32>
    %57 = arith.addf %56, %30 : vector<2x64xf32>
    %58 = arith.negf %57 : vector<2x64xf32>
    %59 = math.exp %58 : vector<2x64xf32>
    %cst_21 = arith.constant 1.000000e+00 : f32
    %60 = vector.broadcast %cst_21 : f32 to vector<2x64xf32>
    %61 = arith.addf %60, %59 : vector<2x64xf32>
    %62 = arith.divf %60, %61 : vector<2x64xf32>
    %63 = math.tanh %57 : vector<2x64xf32>
    %64 = vector.extract_strided_slice %62 {offsets = [0, 0], sizes = [2, 16], strides = [1, 1]} : vector<2x64xf32> to vector<2x16xf32>
    %65 = vector.extract_strided_slice %62 {offsets = [0, 16], sizes = [2, 16], strides = [1, 1]} : vector<2x64xf32> to vector<2x16xf32>
    %66 = vector.extract_strided_slice %63 {offsets = [0, 32], sizes = [2, 16], strides = [1, 1]} : vector<2x64xf32> to vector<2x16xf32>
    %67 = vector.extract_strided_slice %62 {offsets = [0, 48], sizes = [2, 16], strides = [1, 1]} : vector<2x64xf32> to vector<2x16xf32>
    %68 = arith.mulf %65, %25 : vector<2x16xf32>
    %69 = arith.mulf %64, %66 : vector<2x16xf32>
    %70 = arith.addf %68, %69 : vector<2x16xf32>
    %71 = math.tanh %70 : vector<2x16xf32>
    %72 = arith.mulf %67, %71 : vector<2x16xf32>
    %cst_22 = arith.constant dense<0.000000e+00> : vector<2x128xf32>
    %73 = tpu.matmul %72, %0, %cst_22 {dimension_numbers = #tpu.dot_dimension_numbers<[1], [0], [0], [1], [0, 0, 1, 1], [], []>, precision = #tpu.contract_precision<fp32>} : vector<2x16xf32>, vector<16x128xf32>, vector<2x128xf32> -> vector<2x128xf32>
    %cst_23 = arith.constant dense<0.000000e+00> : vector<2x64xf32>
    %74 = tpu.matmul %49, %1, %cst_23 {dimension_numbers = #tpu.dot_dimension_numbers<[1], [0], [0], [1], [0, 0, 1, 1], [], []>, precision = #tpu.contract_precision<fp32>} : vector<2x16xf32>, vector<16x64xf32>, vector<2x64xf32> -> vector<2x64xf32>
    %75 = vector.extract_strided_slice %73 {offsets = [0, 0], sizes = [2, 64], strides = [1, 1]} : vector<2x128xf32> to vector<2x64xf32>
    %76 = vector.extract_strided_slice %73 {offsets = [0, 64], sizes = [2, 64], strides = [1, 1]} : vector<2x128xf32> to vector<2x64xf32>
    %77 = arith.addf %76, %74 : vector<2x64xf32>
    %78 = vector.broadcast %2 : vector<1x64xf32> to vector<2x64xf32>
    %79 = arith.addf %77, %78 : vector<2x64xf32>
    %80 = arith.negf %79 : vector<2x64xf32>
    %81 = math.exp %80 : vector<2x64xf32>
    %cst_24 = arith.constant 1.000000e+00 : f32
    %82 = vector.broadcast %cst_24 : f32 to vector<2x64xf32>
    %83 = arith.addf %82, %81 : vector<2x64xf32>
    %84 = arith.divf %82, %83 : vector<2x64xf32>
    %85 = math.tanh %79 : vector<2x64xf32>
    %86 = vector.extract_strided_slice %84 {offsets = [0, 0], sizes = [2, 16], strides = [1, 1]} : vector<2x64xf32> to vector<2x16xf32>
    %87 = vector.extract_strided_slice %84 {offsets = [0, 16], sizes = [2, 16], strides = [1, 1]} : vector<2x64xf32> to vector<2x16xf32>
    %88 = vector.extract_strided_slice %85 {offsets = [0, 32], sizes = [2, 16], strides = [1, 1]} : vector<2x64xf32> to vector<2x16xf32>
    %89 = vector.extract_strided_slice %84 {offsets = [0, 48], sizes = [2, 16], strides = [1, 1]} : vector<2x64xf32> to vector<2x16xf32>
    %90 = arith.mulf %87, %47 : vector<2x16xf32>
    %91 = arith.mulf %86, %88 : vector<2x16xf32>
    %92 = arith.addf %90, %91 : vector<2x16xf32>
    %93 = math.tanh %92 : vector<2x16xf32>
    %94 = arith.mulf %89, %93 : vector<2x16xf32>
    %c0_25 = arith.constant 0 : index
    %c2 = arith.constant 2 : index
    %95 = memref.load %arg0[%c0_25, %c2] : memref<2x8xi32, #tpu.memory_space<smem>>
    %96 = arith.index_cast %95 : i32 to index
    %c0_26 = arith.constant 0 : index
    %97 = vector.load %arg1[%96, %c0_26] : memref<32x64xf32, #tpu.memory_space<vmem>>, vector<1x64xf32>
    %c1_27 = arith.constant 1 : index
    %c2_28 = arith.constant 2 : index
    %98 = memref.load %arg0[%c1_27, %c2_28] : memref<2x8xi32, #tpu.memory_space<smem>>
    %99 = arith.index_cast %98 : i32 to index
    %c0_29 = arith.constant 0 : index
    %100 = vector.load %arg1[%99, %c0_29] : memref<32x64xf32, #tpu.memory_space<vmem>>, vector<1x64xf32>
    %101 = tpu.concatenate %97, %100 in 0 : vector<1x64xf32>, vector<1x64xf32> -> vector<2x64xf32>
    %102 = arith.addf %101, %75 : vector<2x64xf32>
    %103 = arith.negf %102 : vector<2x64xf32>
    %104 = math.exp %103 : vector<2x64xf32>
    %cst_30 = arith.constant 1.000000e+00 : f32
    %105 = vector.broadcast %cst_30 : f32 to vector<2x64xf32>
    %106 = arith.addf %105, %104 : vector<2x64xf32>
    %107 = arith.divf %105, %106 : vector<2x64xf32>
    %108 = math.tanh %102 : vector<2x64xf32>
    %109 = vector.extract_strided_slice %107 {offsets = [0, 0], sizes = [2, 16], strides = [1, 1]} : vector<2x64xf32> to vector<2x16xf32>
    %110 = vector.extract_strided_slice %107 {offsets = [0, 16], sizes = [2, 16], strides = [1, 1]} : vector<2x64xf32> to vector<2x16xf32>
    %111 = vector.extract_strided_slice %108 {offsets = [0, 32], sizes = [2, 16], strides = [1, 1]} : vector<2x64xf32> to vector<2x16xf32>
    %112 = vector.extract_strided_slice %107 {offsets = [0, 48], sizes = [2, 16], strides = [1, 1]} : vector<2x64xf32> to vector<2x16xf32>
    %113 = arith.mulf %110, %70 : vector<2x16xf32>
    %114 = arith.mulf %109, %111 : vector<2x16xf32>
    %115 = arith.addf %113, %114 : vector<2x16xf32>
    %116 = math.tanh %115 : vector<2x16xf32>
    %117 = arith.mulf %112, %116 : vector<2x16xf32>
    %cst_31 = arith.constant dense<0.000000e+00> : vector<2x128xf32>
    %118 = tpu.matmul %117, %0, %cst_31 {dimension_numbers = #tpu.dot_dimension_numbers<[1], [0], [0], [1], [0, 0, 1, 1], [], []>, precision = #tpu.contract_precision<fp32>} : vector<2x16xf32>, vector<16x128xf32>, vector<2x128xf32> -> vector<2x128xf32>
    %cst_32 = arith.constant dense<0.000000e+00> : vector<2x64xf32>
    %119 = tpu.matmul %94, %1, %cst_32 {dimension_numbers = #tpu.dot_dimension_numbers<[1], [0], [0], [1], [0, 0, 1, 1], [], []>, precision = #tpu.contract_precision<fp32>} : vector<2x16xf32>, vector<16x64xf32>, vector<2x64xf32> -> vector<2x64xf32>
    %120 = vector.extract_strided_slice %118 {offsets = [0, 0], sizes = [2, 64], strides = [1, 1]} : vector<2x128xf32> to vector<2x64xf32>
    %121 = vector.extract_strided_slice %118 {offsets = [0, 64], sizes = [2, 64], strides = [1, 1]} : vector<2x128xf32> to vector<2x64xf32>
    %122 = arith.addf %121, %119 : vector<2x64xf32>
    %123 = vector.broadcast %2 : vector<1x64xf32> to vector<2x64xf32>
    %124 = arith.addf %122, %123 : vector<2x64xf32>
    %125 = arith.negf %124 : vector<2x64xf32>
    %126 = math.exp %125 : vector<2x64xf32>
    %cst_33 = arith.constant 1.000000e+00 : f32
    %127 = vector.broadcast %cst_33 : f32 to vector<2x64xf32>
    %128 = arith.addf %127, %126 : vector<2x64xf32>
    %129 = arith.divf %127, %128 : vector<2x64xf32>
    %130 = math.tanh %124 : vector<2x64xf32>
    %131 = vector.extract_strided_slice %129 {offsets = [0, 0], sizes = [2, 16], strides = [1, 1]} : vector<2x64xf32> to vector<2x16xf32>
    %132 = vector.extract_strided_slice %129 {offsets = [0, 16], sizes = [2, 16], strides = [1, 1]} : vector<2x64xf32> to vector<2x16xf32>
    %133 = vector.extract_strided_slice %130 {offsets = [0, 32], sizes = [2, 16], strides = [1, 1]} : vector<2x64xf32> to vector<2x16xf32>
    %134 = vector.extract_strided_slice %129 {offsets = [0, 48], sizes = [2, 16], strides = [1, 1]} : vector<2x64xf32> to vector<2x16xf32>
    %135 = arith.mulf %132, %92 : vector<2x16xf32>
    %136 = arith.mulf %131, %133 : vector<2x16xf32>
    %137 = arith.addf %135, %136 : vector<2x16xf32>
    %138 = math.tanh %137 : vector<2x16xf32>
    %139 = arith.mulf %134, %138 : vector<2x16xf32>
    %c0_34 = arith.constant 0 : index
    %c3 = arith.constant 3 : index
    %140 = memref.load %arg0[%c0_34, %c3] : memref<2x8xi32, #tpu.memory_space<smem>>
    %141 = arith.index_cast %140 : i32 to index
    %c0_35 = arith.constant 0 : index
    %142 = vector.load %arg1[%141, %c0_35] : memref<32x64xf32, #tpu.memory_space<vmem>>, vector<1x64xf32>
    %c1_36 = arith.constant 1 : index
    %c3_37 = arith.constant 3 : index
    %143 = memref.load %arg0[%c1_36, %c3_37] : memref<2x8xi32, #tpu.memory_space<smem>>
    %144 = arith.index_cast %143 : i32 to index
    %c0_38 = arith.constant 0 : index
    %145 = vector.load %arg1[%144, %c0_38] : memref<32x64xf32, #tpu.memory_space<vmem>>, vector<1x64xf32>
    %146 = tpu.concatenate %142, %145 in 0 : vector<1x64xf32>, vector<1x64xf32> -> vector<2x64xf32>
    %147 = arith.addf %146, %120 : vector<2x64xf32>
    %148 = arith.negf %147 : vector<2x64xf32>
    %149 = math.exp %148 : vector<2x64xf32>
    %cst_39 = arith.constant 1.000000e+00 : f32
    %150 = vector.broadcast %cst_39 : f32 to vector<2x64xf32>
    %151 = arith.addf %150, %149 : vector<2x64xf32>
    %152 = arith.divf %150, %151 : vector<2x64xf32>
    %153 = math.tanh %147 : vector<2x64xf32>
    %154 = vector.extract_strided_slice %152 {offsets = [0, 0], sizes = [2, 16], strides = [1, 1]} : vector<2x64xf32> to vector<2x16xf32>
    %155 = vector.extract_strided_slice %152 {offsets = [0, 16], sizes = [2, 16], strides = [1, 1]} : vector<2x64xf32> to vector<2x16xf32>
    %156 = vector.extract_strided_slice %153 {offsets = [0, 32], sizes = [2, 16], strides = [1, 1]} : vector<2x64xf32> to vector<2x16xf32>
    %157 = vector.extract_strided_slice %152 {offsets = [0, 48], sizes = [2, 16], strides = [1, 1]} : vector<2x64xf32> to vector<2x16xf32>
    %158 = arith.mulf %155, %115 : vector<2x16xf32>
    %159 = arith.mulf %154, %156 : vector<2x16xf32>
    %160 = arith.addf %158, %159 : vector<2x16xf32>
    %161 = math.tanh %160 : vector<2x16xf32>
    %162 = arith.mulf %157, %161 : vector<2x16xf32>
    %cst_40 = arith.constant dense<0.000000e+00> : vector<2x128xf32>
    %163 = tpu.matmul %162, %0, %cst_40 {dimension_numbers = #tpu.dot_dimension_numbers<[1], [0], [0], [1], [0, 0, 1, 1], [], []>, precision = #tpu.contract_precision<fp32>} : vector<2x16xf32>, vector<16x128xf32>, vector<2x128xf32> -> vector<2x128xf32>
    %cst_41 = arith.constant dense<0.000000e+00> : vector<2x64xf32>
    %164 = tpu.matmul %139, %1, %cst_41 {dimension_numbers = #tpu.dot_dimension_numbers<[1], [0], [0], [1], [0, 0, 1, 1], [], []>, precision = #tpu.contract_precision<fp32>} : vector<2x16xf32>, vector<16x64xf32>, vector<2x64xf32> -> vector<2x64xf32>
    %165 = vector.extract_strided_slice %163 {offsets = [0, 0], sizes = [2, 64], strides = [1, 1]} : vector<2x128xf32> to vector<2x64xf32>
    %166 = vector.extract_strided_slice %163 {offsets = [0, 64], sizes = [2, 64], strides = [1, 1]} : vector<2x128xf32> to vector<2x64xf32>
    %167 = arith.addf %166, %164 : vector<2x64xf32>
    %168 = vector.broadcast %2 : vector<1x64xf32> to vector<2x64xf32>
    %169 = arith.addf %167, %168 : vector<2x64xf32>
    %170 = arith.negf %169 : vector<2x64xf32>
    %171 = math.exp %170 : vector<2x64xf32>
    %cst_42 = arith.constant 1.000000e+00 : f32
    %172 = vector.broadcast %cst_42 : f32 to vector<2x64xf32>
    %173 = arith.addf %172, %171 : vector<2x64xf32>
    %174 = arith.divf %172, %173 : vector<2x64xf32>
    %175 = math.tanh %169 : vector<2x64xf32>
    %176 = vector.extract_strided_slice %174 {offsets = [0, 0], sizes = [2, 16], strides = [1, 1]} : vector<2x64xf32> to vector<2x16xf32>
    %177 = vector.extract_strided_slice %174 {offsets = [0, 16], sizes = [2, 16], strides = [1, 1]} : vector<2x64xf32> to vector<2x16xf32>
    %178 = vector.extract_strided_slice %175 {offsets = [0, 32], sizes = [2, 16], strides = [1, 1]} : vector<2x64xf32> to vector<2x16xf32>
    %179 = vector.extract_strided_slice %174 {offsets = [0, 48], sizes = [2, 16], strides = [1, 1]} : vector<2x64xf32> to vector<2x16xf32>
    %180 = arith.mulf %177, %137 : vector<2x16xf32>
    %181 = arith.mulf %176, %178 : vector<2x16xf32>
    %182 = arith.addf %180, %181 : vector<2x16xf32>
    %183 = math.tanh %182 : vector<2x16xf32>
    %184 = arith.mulf %179, %183 : vector<2x16xf32>
    %c0_43 = arith.constant 0 : index
    %c4 = arith.constant 4 : index
    %185 = memref.load %arg0[%c0_43, %c4] : memref<2x8xi32, #tpu.memory_space<smem>>
    %186 = arith.index_cast %185 : i32 to index
    %c0_44 = arith.constant 0 : index
    %187 = vector.load %arg1[%186, %c0_44] : memref<32x64xf32, #tpu.memory_space<vmem>>, vector<1x64xf32>
    %c1_45 = arith.constant 1 : index
    %c4_46 = arith.constant 4 : index
    %188 = memref.load %arg0[%c1_45, %c4_46] : memref<2x8xi32, #tpu.memory_space<smem>>
    %189 = arith.index_cast %188 : i32 to index
    %c0_47 = arith.constant 0 : index
    %190 = vector.load %arg1[%189, %c0_47] : memref<32x64xf32, #tpu.memory_space<vmem>>, vector<1x64xf32>
    %191 = tpu.concatenate %187, %190 in 0 : vector<1x64xf32>, vector<1x64xf32> -> vector<2x64xf32>
    %192 = arith.addf %191, %165 : vector<2x64xf32>
    %193 = arith.negf %192 : vector<2x64xf32>
    %194 = math.exp %193 : vector<2x64xf32>
    %cst_48 = arith.constant 1.000000e+00 : f32
    %195 = vector.broadcast %cst_48 : f32 to vector<2x64xf32>
    %196 = arith.addf %195, %194 : vector<2x64xf32>
    %197 = arith.divf %195, %196 : vector<2x64xf32>
    %198 = math.tanh %192 : vector<2x64xf32>
    %199 = vector.extract_strided_slice %197 {offsets = [0, 0], sizes = [2, 16], strides = [1, 1]} : vector<2x64xf32> to vector<2x16xf32>
    %200 = vector.extract_strided_slice %197 {offsets = [0, 16], sizes = [2, 16], strides = [1, 1]} : vector<2x64xf32> to vector<2x16xf32>
    %201 = vector.extract_strided_slice %198 {offsets = [0, 32], sizes = [2, 16], strides = [1, 1]} : vector<2x64xf32> to vector<2x16xf32>
    %202 = vector.extract_strided_slice %197 {offsets = [0, 48], sizes = [2, 16], strides = [1, 1]} : vector<2x64xf32> to vector<2x16xf32>
    %203 = arith.mulf %200, %160 : vector<2x16xf32>
    %204 = arith.mulf %199, %201 : vector<2x16xf32>
    %205 = arith.addf %203, %204 : vector<2x16xf32>
    %206 = math.tanh %205 : vector<2x16xf32>
    %207 = arith.mulf %202, %206 : vector<2x16xf32>
    %cst_49 = arith.constant dense<0.000000e+00> : vector<2x128xf32>
    %208 = tpu.matmul %207, %0, %cst_49 {dimension_numbers = #tpu.dot_dimension_numbers<[1], [0], [0], [1], [0, 0, 1, 1], [], []>, precision = #tpu.contract_precision<fp32>} : vector<2x16xf32>, vector<16x128xf32>, vector<2x128xf32> -> vector<2x128xf32>
    %cst_50 = arith.constant dense<0.000000e+00> : vector<2x64xf32>
    %209 = tpu.matmul %184, %1, %cst_50 {dimension_numbers = #tpu.dot_dimension_numbers<[1], [0], [0], [1], [0, 0, 1, 1], [], []>, precision = #tpu.contract_precision<fp32>} : vector<2x16xf32>, vector<16x64xf32>, vector<2x64xf32> -> vector<2x64xf32>
    %210 = vector.extract_strided_slice %208 {offsets = [0, 0], sizes = [2, 64], strides = [1, 1]} : vector<2x128xf32> to vector<2x64xf32>
    %211 = vector.extract_strided_slice %208 {offsets = [0, 64], sizes = [2, 64], strides = [1, 1]} : vector<2x128xf32> to vector<2x64xf32>
    %212 = arith.addf %211, %209 : vector<2x64xf32>
    %213 = vector.broadcast %2 : vector<1x64xf32> to vector<2x64xf32>
    %214 = arith.addf %212, %213 : vector<2x64xf32>
    %215 = arith.negf %214 : vector<2x64xf32>
    %216 = math.exp %215 : vector<2x64xf32>
    %cst_51 = arith.constant 1.000000e+00 : f32
    %217 = vector.broadcast %cst_51 : f32 to vector<2x64xf32>
    %218 = arith.addf %217, %216 : vector<2x64xf32>
    %219 = arith.divf %217, %218 : vector<2x64xf32>
    %220 = math.tanh %214 : vector<2x64xf32>
    %221 = vector.extract_strided_slice %219 {offsets = [0, 0], sizes = [2, 16], strides = [1, 1]} : vector<2x64xf32> to vector<2x16xf32>
    %222 = vector.extract_strided_slice %219 {offsets = [0, 16], sizes = [2, 16], strides = [1, 1]} : vector<2x64xf32> to vector<2x16xf32>
    %223 = vector.extract_strided_slice %220 {offsets = [0, 32], sizes = [2, 16], strides = [1, 1]} : vector<2x64xf32> to vector<2x16xf32>
    %224 = vector.extract_strided_slice %219 {offsets = [0, 48], sizes = [2, 16], strides = [1, 1]} : vector<2x64xf32> to vector<2x16xf32>
    %225 = arith.mulf %222, %182 : vector<2x16xf32>
    %226 = arith.mulf %221, %223 : vector<2x16xf32>
    %227 = arith.addf %225, %226 : vector<2x16xf32>
    %228 = math.tanh %227 : vector<2x16xf32>
    %229 = arith.mulf %224, %228 : vector<2x16xf32>
    %c0_52 = arith.constant 0 : index
    %c5 = arith.constant 5 : index
    %230 = memref.load %arg0[%c0_52, %c5] : memref<2x8xi32, #tpu.memory_space<smem>>
    %231 = arith.index_cast %230 : i32 to index
    %c0_53 = arith.constant 0 : index
    %232 = vector.load %arg1[%231, %c0_53] : memref<32x64xf32, #tpu.memory_space<vmem>>, vector<1x64xf32>
    %c1_54 = arith.constant 1 : index
    %c5_55 = arith.constant 5 : index
    %233 = memref.load %arg0[%c1_54, %c5_55] : memref<2x8xi32, #tpu.memory_space<smem>>
    %234 = arith.index_cast %233 : i32 to index
    %c0_56 = arith.constant 0 : index
    %235 = vector.load %arg1[%234, %c0_56] : memref<32x64xf32, #tpu.memory_space<vmem>>, vector<1x64xf32>
    %236 = tpu.concatenate %232, %235 in 0 : vector<1x64xf32>, vector<1x64xf32> -> vector<2x64xf32>
    %237 = arith.addf %236, %210 : vector<2x64xf32>
    %238 = arith.negf %237 : vector<2x64xf32>
    %239 = math.exp %238 : vector<2x64xf32>
    %cst_57 = arith.constant 1.000000e+00 : f32
    %240 = vector.broadcast %cst_57 : f32 to vector<2x64xf32>
    %241 = arith.addf %240, %239 : vector<2x64xf32>
    %242 = arith.divf %240, %241 : vector<2x64xf32>
    %243 = math.tanh %237 : vector<2x64xf32>
    %244 = vector.extract_strided_slice %242 {offsets = [0, 0], sizes = [2, 16], strides = [1, 1]} : vector<2x64xf32> to vector<2x16xf32>
    %245 = vector.extract_strided_slice %242 {offsets = [0, 16], sizes = [2, 16], strides = [1, 1]} : vector<2x64xf32> to vector<2x16xf32>
    %246 = vector.extract_strided_slice %243 {offsets = [0, 32], sizes = [2, 16], strides = [1, 1]} : vector<2x64xf32> to vector<2x16xf32>
    %247 = vector.extract_strided_slice %242 {offsets = [0, 48], sizes = [2, 16], strides = [1, 1]} : vector<2x64xf32> to vector<2x16xf32>
    %248 = arith.mulf %245, %205 : vector<2x16xf32>
    %249 = arith.mulf %244, %246 : vector<2x16xf32>
    %250 = arith.addf %248, %249 : vector<2x16xf32>
    %251 = math.tanh %250 : vector<2x16xf32>
    %252 = arith.mulf %247, %251 : vector<2x16xf32>
    %cst_58 = arith.constant dense<0.000000e+00> : vector<2x128xf32>
    %253 = tpu.matmul %252, %0, %cst_58 {dimension_numbers = #tpu.dot_dimension_numbers<[1], [0], [0], [1], [0, 0, 1, 1], [], []>, precision = #tpu.contract_precision<fp32>} : vector<2x16xf32>, vector<16x128xf32>, vector<2x128xf32> -> vector<2x128xf32>
    %cst_59 = arith.constant dense<0.000000e+00> : vector<2x64xf32>
    %254 = tpu.matmul %229, %1, %cst_59 {dimension_numbers = #tpu.dot_dimension_numbers<[1], [0], [0], [1], [0, 0, 1, 1], [], []>, precision = #tpu.contract_precision<fp32>} : vector<2x16xf32>, vector<16x64xf32>, vector<2x64xf32> -> vector<2x64xf32>
    %255 = vector.extract_strided_slice %253 {offsets = [0, 0], sizes = [2, 64], strides = [1, 1]} : vector<2x128xf32> to vector<2x64xf32>
    %256 = vector.extract_strided_slice %253 {offsets = [0, 64], sizes = [2, 64], strides = [1, 1]} : vector<2x128xf32> to vector<2x64xf32>
    %257 = arith.addf %256, %254 : vector<2x64xf32>
    %258 = vector.broadcast %2 : vector<1x64xf32> to vector<2x64xf32>
    %259 = arith.addf %257, %258 : vector<2x64xf32>
    %260 = arith.negf %259 : vector<2x64xf32>
    %261 = math.exp %260 : vector<2x64xf32>
    %cst_60 = arith.constant 1.000000e+00 : f32
    %262 = vector.broadcast %cst_60 : f32 to vector<2x64xf32>
    %263 = arith.addf %262, %261 : vector<2x64xf32>
    %264 = arith.divf %262, %263 : vector<2x64xf32>
    %265 = math.tanh %259 : vector<2x64xf32>
    %266 = vector.extract_strided_slice %264 {offsets = [0, 0], sizes = [2, 16], strides = [1, 1]} : vector<2x64xf32> to vector<2x16xf32>
    %267 = vector.extract_strided_slice %264 {offsets = [0, 16], sizes = [2, 16], strides = [1, 1]} : vector<2x64xf32> to vector<2x16xf32>
    %268 = vector.extract_strided_slice %265 {offsets = [0, 32], sizes = [2, 16], strides = [1, 1]} : vector<2x64xf32> to vector<2x16xf32>
    %269 = vector.extract_strided_slice %264 {offsets = [0, 48], sizes = [2, 16], strides = [1, 1]} : vector<2x64xf32> to vector<2x16xf32>
    %270 = arith.mulf %267, %227 : vector<2x16xf32>
    %271 = arith.mulf %266, %268 : vector<2x16xf32>
    %272 = arith.addf %270, %271 : vector<2x16xf32>
    %273 = math.tanh %272 : vector<2x16xf32>
    %274 = arith.mulf %269, %273 : vector<2x16xf32>
    %c0_61 = arith.constant 0 : index
    %c6 = arith.constant 6 : index
    %275 = memref.load %arg0[%c0_61, %c6] : memref<2x8xi32, #tpu.memory_space<smem>>
    %276 = arith.index_cast %275 : i32 to index
    %c0_62 = arith.constant 0 : index
    %277 = vector.load %arg1[%276, %c0_62] : memref<32x64xf32, #tpu.memory_space<vmem>>, vector<1x64xf32>
    %c1_63 = arith.constant 1 : index
    %c6_64 = arith.constant 6 : index
    %278 = memref.load %arg0[%c1_63, %c6_64] : memref<2x8xi32, #tpu.memory_space<smem>>
    %279 = arith.index_cast %278 : i32 to index
    %c0_65 = arith.constant 0 : index
    %280 = vector.load %arg1[%279, %c0_65] : memref<32x64xf32, #tpu.memory_space<vmem>>, vector<1x64xf32>
    %281 = tpu.concatenate %277, %280 in 0 : vector<1x64xf32>, vector<1x64xf32> -> vector<2x64xf32>
    %282 = arith.addf %281, %255 : vector<2x64xf32>
    %283 = arith.negf %282 : vector<2x64xf32>
    %284 = math.exp %283 : vector<2x64xf32>
    %cst_66 = arith.constant 1.000000e+00 : f32
    %285 = vector.broadcast %cst_66 : f32 to vector<2x64xf32>
    %286 = arith.addf %285, %284 : vector<2x64xf32>
    %287 = arith.divf %285, %286 : vector<2x64xf32>
    %288 = math.tanh %282 : vector<2x64xf32>
    %289 = vector.extract_strided_slice %287 {offsets = [0, 0], sizes = [2, 16], strides = [1, 1]} : vector<2x64xf32> to vector<2x16xf32>
    %290 = vector.extract_strided_slice %287 {offsets = [0, 16], sizes = [2, 16], strides = [1, 1]} : vector<2x64xf32> to vector<2x16xf32>
    %291 = vector.extract_strided_slice %288 {offsets = [0, 32], sizes = [2, 16], strides = [1, 1]} : vector<2x64xf32> to vector<2x16xf32>
    %292 = vector.extract_strided_slice %287 {offsets = [0, 48], sizes = [2, 16], strides = [1, 1]} : vector<2x64xf32> to vector<2x16xf32>
    %293 = arith.mulf %290, %250 : vector<2x16xf32>
    %294 = arith.mulf %289, %291 : vector<2x16xf32>
    %295 = arith.addf %293, %294 : vector<2x16xf32>
    %296 = math.tanh %295 : vector<2x16xf32>
    %297 = arith.mulf %292, %296 : vector<2x16xf32>
    %cst_67 = arith.constant dense<0.000000e+00> : vector<2x128xf32>
    %298 = tpu.matmul %297, %0, %cst_67 {dimension_numbers = #tpu.dot_dimension_numbers<[1], [0], [0], [1], [0, 0, 1, 1], [], []>, precision = #tpu.contract_precision<fp32>} : vector<2x16xf32>, vector<16x128xf32>, vector<2x128xf32> -> vector<2x128xf32>
    %cst_68 = arith.constant dense<0.000000e+00> : vector<2x64xf32>
    %299 = tpu.matmul %274, %1, %cst_68 {dimension_numbers = #tpu.dot_dimension_numbers<[1], [0], [0], [1], [0, 0, 1, 1], [], []>, precision = #tpu.contract_precision<fp32>} : vector<2x16xf32>, vector<16x64xf32>, vector<2x64xf32> -> vector<2x64xf32>
    %300 = vector.extract_strided_slice %298 {offsets = [0, 0], sizes = [2, 64], strides = [1, 1]} : vector<2x128xf32> to vector<2x64xf32>
    %301 = vector.extract_strided_slice %298 {offsets = [0, 64], sizes = [2, 64], strides = [1, 1]} : vector<2x128xf32> to vector<2x64xf32>
    %302 = arith.addf %301, %299 : vector<2x64xf32>
    %303 = vector.broadcast %2 : vector<1x64xf32> to vector<2x64xf32>
    %304 = arith.addf %302, %303 : vector<2x64xf32>
    %305 = arith.negf %304 : vector<2x64xf32>
    %306 = math.exp %305 : vector<2x64xf32>
    %cst_69 = arith.constant 1.000000e+00 : f32
    %307 = vector.broadcast %cst_69 : f32 to vector<2x64xf32>
    %308 = arith.addf %307, %306 : vector<2x64xf32>
    %309 = arith.divf %307, %308 : vector<2x64xf32>
    %310 = math.tanh %304 : vector<2x64xf32>
    %311 = vector.extract_strided_slice %309 {offsets = [0, 0], sizes = [2, 16], strides = [1, 1]} : vector<2x64xf32> to vector<2x16xf32>
    %312 = vector.extract_strided_slice %309 {offsets = [0, 16], sizes = [2, 16], strides = [1, 1]} : vector<2x64xf32> to vector<2x16xf32>
    %313 = vector.extract_strided_slice %310 {offsets = [0, 32], sizes = [2, 16], strides = [1, 1]} : vector<2x64xf32> to vector<2x16xf32>
    %314 = vector.extract_strided_slice %309 {offsets = [0, 48], sizes = [2, 16], strides = [1, 1]} : vector<2x64xf32> to vector<2x16xf32>
    %315 = arith.mulf %312, %272 : vector<2x16xf32>
    %316 = arith.mulf %311, %313 : vector<2x16xf32>
    %317 = arith.addf %315, %316 : vector<2x16xf32>
    %318 = math.tanh %317 : vector<2x16xf32>
    %319 = arith.mulf %314, %318 : vector<2x16xf32>
    %c0_70 = arith.constant 0 : index
    %c7 = arith.constant 7 : index
    %320 = memref.load %arg0[%c0_70, %c7] : memref<2x8xi32, #tpu.memory_space<smem>>
    %321 = arith.index_cast %320 : i32 to index
    %c0_71 = arith.constant 0 : index
    %322 = vector.load %arg1[%321, %c0_71] : memref<32x64xf32, #tpu.memory_space<vmem>>, vector<1x64xf32>
    %c1_72 = arith.constant 1 : index
    %c7_73 = arith.constant 7 : index
    %323 = memref.load %arg0[%c1_72, %c7_73] : memref<2x8xi32, #tpu.memory_space<smem>>
    %324 = arith.index_cast %323 : i32 to index
    %c0_74 = arith.constant 0 : index
    %325 = vector.load %arg1[%324, %c0_74] : memref<32x64xf32, #tpu.memory_space<vmem>>, vector<1x64xf32>
    %326 = tpu.concatenate %322, %325 in 0 : vector<1x64xf32>, vector<1x64xf32> -> vector<2x64xf32>
    %327 = arith.addf %326, %300 : vector<2x64xf32>
    %328 = arith.negf %327 : vector<2x64xf32>
    %329 = math.exp %328 : vector<2x64xf32>
    %cst_75 = arith.constant 1.000000e+00 : f32
    %330 = vector.broadcast %cst_75 : f32 to vector<2x64xf32>
    %331 = arith.addf %330, %329 : vector<2x64xf32>
    %332 = arith.divf %330, %331 : vector<2x64xf32>
    %333 = math.tanh %327 : vector<2x64xf32>
    %334 = vector.extract_strided_slice %332 {offsets = [0, 0], sizes = [2, 16], strides = [1, 1]} : vector<2x64xf32> to vector<2x16xf32>
    %335 = vector.extract_strided_slice %332 {offsets = [0, 16], sizes = [2, 16], strides = [1, 1]} : vector<2x64xf32> to vector<2x16xf32>
    %336 = vector.extract_strided_slice %333 {offsets = [0, 32], sizes = [2, 16], strides = [1, 1]} : vector<2x64xf32> to vector<2x16xf32>
    %337 = vector.extract_strided_slice %332 {offsets = [0, 48], sizes = [2, 16], strides = [1, 1]} : vector<2x64xf32> to vector<2x16xf32>
    %338 = arith.mulf %335, %295 : vector<2x16xf32>
    %339 = arith.mulf %334, %336 : vector<2x16xf32>
    %340 = arith.addf %338, %339 : vector<2x16xf32>
    %341 = math.tanh %340 : vector<2x16xf32>
    %342 = arith.mulf %337, %341 : vector<2x16xf32>
    %cst_76 = arith.constant dense<0.000000e+00> : vector<2x128xf32>
    %343 = tpu.matmul %342, %0, %cst_76 {dimension_numbers = #tpu.dot_dimension_numbers<[1], [0], [0], [1], [0, 0, 1, 1], [], []>, precision = #tpu.contract_precision<fp32>} : vector<2x16xf32>, vector<16x128xf32>, vector<2x128xf32> -> vector<2x128xf32>
    %cst_77 = arith.constant dense<0.000000e+00> : vector<2x64xf32>
    %344 = tpu.matmul %319, %1, %cst_77 {dimension_numbers = #tpu.dot_dimension_numbers<[1], [0], [0], [1], [0, 0, 1, 1], [], []>, precision = #tpu.contract_precision<fp32>} : vector<2x16xf32>, vector<16x64xf32>, vector<2x64xf32> -> vector<2x64xf32>
    %345 = vector.extract_strided_slice %343 {offsets = [0, 64], sizes = [2, 64], strides = [1, 1]} : vector<2x128xf32> to vector<2x64xf32>
    %346 = arith.addf %345, %344 : vector<2x64xf32>
    %347 = vector.broadcast %2 : vector<1x64xf32> to vector<2x64xf32>
    %348 = arith.addf %346, %347 : vector<2x64xf32>
    %349 = arith.negf %348 : vector<2x64xf32>
    %350 = math.exp %349 : vector<2x64xf32>
    %cst_78 = arith.constant 1.000000e+00 : f32
    %351 = vector.broadcast %cst_78 : f32 to vector<2x64xf32>
    %352 = arith.addf %351, %350 : vector<2x64xf32>
    %353 = arith.divf %351, %352 : vector<2x64xf32>
    %354 = math.tanh %348 : vector<2x64xf32>
    %355 = vector.extract_strided_slice %353 {offsets = [0, 0], sizes = [2, 16], strides = [1, 1]} : vector<2x64xf32> to vector<2x16xf32>
    %356 = vector.extract_strided_slice %353 {offsets = [0, 16], sizes = [2, 16], strides = [1, 1]} : vector<2x64xf32> to vector<2x16xf32>
    %357 = vector.extract_strided_slice %354 {offsets = [0, 32], sizes = [2, 16], strides = [1, 1]} : vector<2x64xf32> to vector<2x16xf32>
    %358 = vector.extract_strided_slice %353 {offsets = [0, 48], sizes = [2, 16], strides = [1, 1]} : vector<2x64xf32> to vector<2x16xf32>
    %359 = arith.mulf %356, %317 : vector<2x16xf32>
    %360 = arith.mulf %355, %357 : vector<2x16xf32>
    %361 = arith.addf %359, %360 : vector<2x16xf32>
    %362 = math.tanh %361 : vector<2x16xf32>
    %363 = arith.mulf %358, %362 : vector<2x16xf32>
    %364 = tpu.concatenate %49, %94, %139, %184, %229, %274, %319, %363 in 1 : vector<2x16xf32>, vector<2x16xf32>, vector<2x16xf32>, vector<2x16xf32>, vector<2x16xf32>, vector<2x16xf32>, vector<2x16xf32>, vector<2x16xf32> -> vector<2x128xf32>
    %c0_79 = arith.constant 0 : index
    %c0_80 = arith.constant 0 : index
    %365 = vector.load %arg5[%c0_79, %c0_80] : memref<2x128xf32, #tpu.memory_space<vmem>>, vector<2x128xf32>
    tpu.vector_store %arg5[%c0_79, %c0_80], %364 {strides = array<i32>} : memref<2x128xf32, #tpu.memory_space<vmem>>, vector<2x128xf32>,
    return
  }
}

</mosaic_0001>

<bundles_post_ra>
// kernel: simple_lm_forward.1
= control target key start
LH: loop header
LB: loop body
LE: loop exit
PB: predicated region body
PF: predicated region fallthrough
CT: control target
= control target key end

     0   :  { %10 = vsyncpa [#allocation4], 0  ;;  %s10449_s0 = inlined_call_operand.hbm [shape: s32[2,8], index: 0, kind: input, shape index: {}]   ;;  %s10450_s1 = inlined_call_operand.hbm [shape: f32[32,64], index: 1, kind: input, shape index: {}]   ;;  %s10451_s2 = inlined_call_operand.hbm [shape: f32[16,128], index: 2, kind: input, shape index: {}]   ;;  %s10452_s3 = inlined_call_operand.hbm [shape: f32[16,64], index: 3, kind: input, shape index: {}]   ;;  %s10453_s4 = inlined_call_operand.vmem [shape: f32[1,64], index: 4, kind: input, shape index: {}]   ;;  %s10454_s5 = inlined_call_operand.vmem [shape: f32[2,128], index: 5, kind: output, shape index: {}]  }
   0x1   :  { %11 = vsyncpa [#allocation3], 0 }
   0x2   :  { %12 = vsyncpa [#allocation7], 0  ;;  %s9740_s18 = smov [#allocation6]   ;;  %s9741_s20 = smov [#allocation5]  }
   0x3   :  { %s38_s19 = sshll.u32 %s9740_s18, 4  ;;  %s26_s21 = sshll.u32 %s9741_s20, 4  ;;  %s39_s19 = int_to_ptr.vmem [resolvable:$true] %s38_s19  ;;  %s27_s21 = int_to_ptr.vmem [resolvable:$true] %s26_s21 }
   0x4   :  { %s9658_s24 = scalar_lea.hbm %s10451_s2, 256 }
   0x5   :  { %p9659_p0 = scmp.ne.s32.totalorder %s10451_s2, %s9658_s24  ;;  %p9662_p1 = scmp.lt.u32.totalorder %s9658_s24, %s10451_s2 }
   0x7   :  { %p9664_p2 = pnand %p9662_p1, %p9659_p0 }
   0x9   :  { %9667 = shalt.err (!%p9664_p2)
}
   0xa   :  { %s9668_s29 = scalar_lea.vmem %s39_s19, 256  ;;  %p9673_p4 = scmp.lt.s32.totalorder %s39_s19, %s39_s19 }
   0xb   :  { %p9669_p3 = scmp.ne.s32.totalorder %s39_s19, %s9668_s29  ;;  %p9674_p5 = scmp.lt.s32.totalorder %s9668_s29, %s9668_s29 }
   0xd   :  { %p9675_p6 = por %p9674_p5, %p9673_p4 }
   0xf   :  { %p9676_p7 = pnand %p9675_p6, %p9669_p3 }
  0x11   :  { %9679 = shalt.err (!%p9676_p7)
}
  0x12   :  { %s9742_s30 = smov 128   ;;  %s9743_s6 = smov 8  }
  0x13   :  { %44 = dma.hbm_to_vmem [thread:$0]  %s10451_s2, 256, %s39_s19, [#allocation7], %s9742_s30, %s9742_s30, %s9743_s6  }
  0x14   :  { %s9680_s11 = scalar_lea.hbm %s10449_s0, 32 }
  0x15   :  { %p9681_p8 = scmp.ne.s32.totalorder %s10449_s0, %s9680_s11  ;;  %p9684_p9 = scmp.lt.u32.totalorder %s9680_s11, %s10449_s0 }
  0x17   :  { %p9686_p10 = pnand %p9684_p9, %p9681_p8 }
  0x19   :  { %9689 = shalt.err (!%p9686_p10)
}
  0x1a   :  { %s9744_s16 = smov [#allocation2]   ;;  %s9690_s20 = scalar_lea.hbm %s10450_s1, 512 }
  0x1b   :  { %20 = dma.hbm_to_smem %s10449_s0, 32, %s9744_s16, [#allocation4]  }
  0x1c   :  { %p9691_p11 = scmp.ne.s32.totalorder %s10450_s1, %s9690_s20  ;;  %p9694_p12 = scmp.lt.u32.totalorder %s9690_s20, %s10450_s1 }
  0x1e   :  { %p9696_p13 = pnand %p9694_p12, %p9691_p11 }
  0x20   :  { %9699 = shalt.err (!%p9696_p13)
}
  0x21   :  { %s9700_s26 = scalar_lea.vmem %s27_s21, 512  ;;  %p9705_p1 = scmp.lt.s32.totalorder %s27_s21, %s27_s21 }
  0x22   :  { %p9701_p0 = scmp.ne.s32.totalorder %s27_s21, %s9700_s26  ;;  %p9706_p2 = scmp.lt.s32.totalorder %s9700_s26, %s9700_s26 }
  0x24   :  { %p9707_p3 = por %p9706_p2, %p9705_p1 }
  0x26   :  { %p9708_p4 = pnand %p9707_p3, %p9701_p0 }
  0x28   :  { %9711 = shalt.err (!%p9708_p4)
}
  0x29   :  { %32 = dma.hbm_to_vmem [thread:$0]  %s10450_s1, 512, %s27_s21, [#allocation3], %s9742_s30, %s9742_s30, %s9743_s6  }
  0x2a   :  { %s9745_s28 = smov [#allocation8]   ;;  %s9712_s9 = scalar_lea.hbm %s10452_s3, 256 }
  0x2b   :  { %s50_s29 = sshll.u32 %s9745_s28, 4  ;;  %p9713_p5 = scmp.ne.s32.totalorder %s10452_s3, %s9712_s9  ;;  %s51_s29 = int_to_ptr.vmem [resolvable:$true] %s50_s29 }
  0x2c   :  { %p9716_p6 = scmp.lt.u32.totalorder %s9712_s9, %s10452_s3 }
  0x2e   :  { %p9718_p7 = pnand %p9716_p6, %p9713_p5 }
  0x30   :  { %9721 = shalt.err (!%p9718_p7)
}
  0x31   :  { %s9722_s14 = scalar_lea.vmem %s51_s29, 256  ;;  %p9727_p9 = scmp.lt.s32.totalorder %s51_s29, %s51_s29 }
  0x32   :  { %p9723_p8 = scmp.ne.s32.totalorder %s51_s29, %s9722_s14  ;;  %p9728_p10 = scmp.lt.s32.totalorder %s9722_s14, %s9722_s14 }
  0x34   :  { %p9729_p11 = por %p9728_p10, %p9727_p9 }
  0x36   :  { %p9730_p12 = pnand %p9729_p11, %p9723_p8 }
  0x38   :  { %9733 = shalt.err (!%p9730_p12)
}
  0x39   :  { %56 = dma.hbm_to_vmem [thread:$0]  %s10452_s3, 256, %s51_s29, [#allocation7], %s9742_s30, %s9742_s30, %s9743_s6  }
  0x3a   :  { %9734 = dma.done.wait [#allocation4], 32  }
  0x3b   :  { %9735 = vsyncadd [#allocation4], 4294967264 }
  0x3c   :  { %9736 = dma.done.wait [#allocation3], 512  }
  0x3d   :  { %9737 = vsyncadd [#allocation3], 4294966784 }
  0x3e   :  { %9738 = dma.done.wait [#allocation7], 512  }
  0x3f   :  { %9739 = vsyncadd [#allocation7], 4294966784 }
  0x40   :  { %71 = sfence }
  0x41   :  { %s77_s15 = sld [smem:[#allocation2]]  ;;  %vm86_vm0 = vcmask 1040384   ;;  %s9746_s3 = smov 96   ;;  %v72_v15 = vld [vmem:[#allocation6] sm:$0xff]  ;;  %v73_v16 = vld [vmem:[#allocation6 + $0x8] sm:$0xff]  ;;  %v9749_v20 = vmov 0.0|0.0  }
  0x42   :  { %s8085_s16 = sld [smem:[#allocation2 + $0x80]]  ;;  %s9747_s30 = smov 16   ;;  %v120_v17 = vand.u32 4294901760, %v72_v15  ;;  %v123_v18 = vand.u32 4294901760, %v73_v16  ;;  %9086 = vmatprep.subr.bf16.mxu0 %v9749_v20  ;;  %9077 = vmatprep.subr.bf16.mxu1 %v9749_v20  ;;  %vm9750_vm1 = vmmov 0   ;;  %v9751_v21 = vmov 0.0  }
  0x43   :  { %s9748_s6 = smov 32   ;;  %8430 = vmatprep.mubr.msk.f32.mxu0 %vm9750_vm1, %v9751_v21  ;;  %8409 = vmatprep.mubr.msk.f32.mxu1 %vm9750_vm1, %v9751_v21  ;;  %s9752_s2 = smov 80   ;;  %vm116_vm2 = vcmask 130048   ;;  %v74_v40 = vld [vmem:[#allocation8] sm:$0xff]  ;;  %v75_v41 = vld [vmem:[#allocation8 + $0x8] sm:$0xff]  ;;  %vm8049_vm3 = vcmask 261120  }
  0x44   :  { %v9850_v19 = vpack.c.bf16 %v123_v18, %v120_v17  ;;  %v198_v22 = vsub.f32 %v72_v15, %v120_v17  ;;  %v205_v23 = vsub.f32 %v73_v16, %v123_v18  ;;  %v582_v43 = vand.u32 4294901760, %v74_v40  ;;  %v8087_v58 = vld [vmem:[%s10453_s4] ss:$0 sm:$0xff]  ;;  %s9753_s22 = smov 64   ;;  %s8090_s23 = sld [smem:[#allocation2 + $0x81]] }
  0x45   :  { %v585_v44 = vand.u32 4294901760, %v75_v41  ;;  %s8089_s24 = sld [smem:[#allocation2 + $0x1]]  ;;  %s8094_s4 = sld [smem:[#allocation2 + $0x82]]  ;;  %vm8051_vm4 = vcmask 392192   ;;  %vm8053_vm5 = vcmask 523264   ;;  %vm8055_vm6 = vcmask 654336  }
  0x46   :  { %9088 = vmatpush3.bf16.msra.mxu0 %v9850_v19  ;;  %9079 = vmatpush3.bf16.msra.mxu1 %v9850_v19  ;;  %v199_v24 = vand.u32 4294901760, %v198_v22  ;;  %v206_v25 = vand.u32 4294901760, %v205_v23  ;;  %v9867_v34 = vpack.c.bf16 %v205_v23, %v198_v22  ;;  %v660_v46 = vsub.f32 %v74_v40, %v582_v43  ;;  %s8093_s0 = sld [smem:[#allocation2 + $0x2]]  ;;  %s8098_s29 = sld [smem:[#allocation2 + $0x83]] }
  0x47   :  { %s78_s17 = scalar_lea.vmem [#allocation5], %s77_s15  ;;  %9080 = vmatprep.subr.bf16.mxu1 %v9749_v20  ;;  %9089 = vmatprep.subr.bf16.mxu0 %v9749_v20  ;;  %v667_v47 = vsub.f32 %v75_v41, %v585_v44  ;;  %v9886_v52 = vpack.c.bf16 %v585_v44, %v582_v43  ;;  %s8097_s7 = sld [smem:[#allocation2 + $0x3]]  ;;  %vm8057_vm7 = vcmask 785408   ;;  %vm8059_vm8 = vcmask 916480  }
  0x48   :  { %v79_v0 = vld [vmem:[%s78_s17] sm:$0x1]  ;;  %s81_s18 = scalar_lea.vmem [#allocation5], %s8085_s16  ;;  %v200_v27 = vsub.f32 %v198_v22, %v199_v24  ;;  %v207_v28 = vsub.f32 %v205_v23, %v206_v25  ;;  %v9862_v29 = vpack.c.bf16 %v206_v25, %v199_v24  ;;  %v661_v48 = vand.u32 4294901760, %v660_v46  ;;  %s8102_s10 = sld [smem:[#allocation2 + $0x84]] }
  0x49   :  { %v82_v1 = vld [vmem:[%s81_s18] sm:$0x1]  ;;  %v668_v49 = vand.u32 4294901760, %v667_v47  ;;  %v9903_v56 = vpack.c.bf16 %v667_v47, %v660_v46  ;;  %s8101_s11 = sld [smem:[#allocation2 + $0x4]]  ;;  %s8106_s14 = sld [smem:[#allocation2 + $0x85]] }
  0x4a   :  { %v84_v2 = vrot.slane %v82_v1, 7  ;;  %v201_v31 = vand.u32 4294901760, %v200_v27  ;;  %v208_v32 = vand.u32 4294901760, %v207_v28  ;;  %v662_v50 = vsub.f32 %v660_v46, %v661_v48  ;;  %s1082_s25 = scalar_lea.vmem [#allocation5], %s8090_s23  ;;  %s8105_s1 = sld [smem:[#allocation2 + $0x5]] }
  0x4b   :  { %v669_v51 = vsub.f32 %v667_v47, %v668_v49  ;;  %v9915_v57 = vpack.c.bf16 %v668_v49, %v661_v48  ;;  %v1083_v59 = vld [vmem:[%s1082_s25] sm:$0x1]  ;;  %s1079_s26 = scalar_lea.vmem [#allocation5], %s8089_s24  ;;  %s2075_s27 = scalar_lea.vmem [#allocation5], %s8094_s4 }
  0x4c   :  { %v87_v3 = vsel %vm86_vm0, %v79_v0, %v84_v2  ;;  %v9865_v33 = vpack.c.bf16 %v208_v32, %v201_v31  ;;  %v663_v53 = vand.u32 4294901760, %v662_v50  ;;  %v1085_v61 = vrot.slane %v1083_v59, 7  ;;  %v1080_v63 = vld [vmem:[%s1079_s26] sm:$0x1]  ;;  %s2072_s28 = scalar_lea.vmem [#allocation5], %s8093_s0  ;;  %s3068_s8 = scalar_lea.vmem [#allocation5], %s8098_s29 }
  0x4d   :  { %9530 = vtanh.f32 %v87_v3  ;;  %v8086_v5 = vmul.f32 -1.442695, %v87_v3  ;;  %v670_v54 = vand.u32 4294901760, %v669_v51  ;;  %s3065_s9 = scalar_lea.vmem [#allocation5], %s8097_s7  ;;  %s8110_s16 = sld [smem:[#allocation2 + $0x86]] }
  0x4e   :  { %v1087_v1 = vsel %vm86_vm0, %v1080_v63, %v1085_v61  ;;  %v2076_v63 = vld [vmem:[%s2075_s27] sm:$0x1]  ;;  %s4061_s12 = scalar_lea.vmem [#allocation5], %s8102_s10  ;;  %s8109_s17 = sld [smem:[#allocation2 + $0x6]] }
  0x4f   :  { %9532 = vpow2.f32 %v8086_v5  ;;  %v9895_v55 = vpack.c.bf16 %v670_v54, %v663_v53  ;;  %s4058_s13 = scalar_lea.vmem [#allocation5], %s8101_s11  ;;  %s5054_s21 = scalar_lea.vmem [#allocation5], %s8106_s14 }
  0x50   :  { %s5051_s15 = scalar_lea.vmem [#allocation5], %s8105_s1  ;;  %s8114_s20 = sld [smem:[#allocation2 + $0x87]] }
  0x51   :  { %s8113_s23 = sld [smem:[#allocation2 + $0x7]]  ;;  %s9754_s26 = smov 48  }
  0x53   :  { %s6047_s18 = scalar_lea.vmem [#allocation5], %s8110_s16 }
  0x54   :  { %s6044_s19 = scalar_lea.vmem [#allocation5], %s8109_s17 }
  0x56   :  { %s7040_s24 = scalar_lea.vmem [#allocation5], %s8114_s20 }
  0x57   :  { %v9531_v4 = vpop.eup %9530  ;;  %s7037_s25 = scalar_lea.vmem [#allocation5], %s8113_s23 }
  0x58   :  { %98 = vrot.lane.b32.xlu0 %v9531_v4, %s9746_s3 }
  0x59   :  { %v9533_v6 = vpop.eup %9532 }
  0x5a   :  { %v92_v7 = vadd.f32 1.0, %v9533_v6 }
  0x5c   :  { %9534 = vrcp.f32 %v92_v7 }
  0x66   :  { %v9535_v8 = vpop.eup %9534 }
  0x67   :  { %v96_v11 = vmul.f32 0.0, %v9535_v8 }
  0xca   :  { %v99_v9 = vpop.permute.xlu0 %98 }
  0xcb   :  { %v101_v10 = vmul.f32 %v9535_v8, %v99_v9 }
  0xcd   :  { %103 = vrot.lane.b32.xlu0 %v101_v10, %s9747_s30 }
 0x13f   :  { %v104_v12 = vpop.permute.xlu0 %103 }
 0x140   :  { %v9846_v13 = vadd.f32 %v104_v12, %v96_v11 }
 0x142   :  { %9536 = vtanh.f32 %v9846_v13 }
 0x14c   :  { %v9537_v14 = vpop.eup %9536 }
 0x14d   :  { %109 = vrot.lane.b32.xlu1 %v9537_v14, %s9748_s6 }
 0x1bf   :  { %v110_v26 = vpop.permute.xlu1 %109 }
 0x1c0   :  { %v112_v30 = vmul.f32 %v9535_v8, %v110_v26 }
 0x1c2   :  { %114 = vrot.lane.b32.xlu1 %v112_v30, %s9752_s2 }
 0x1c6   :  { %1050 = vrot.lane.b32.xlu1 %v8087_v58, %s9753_s22 }
 0x234   :  { %v115_v35 = vpop.permute.xlu1 %114 }
 0x235   :  { %v117_v36 = vsel %vm116_vm2, %v115_v35, 0 }
 0x236   :  { %v186_v37 = vand.u32 4294901760, %v117_v36 }
 0x238   :  { %v187_v38 = vsub.f32 %v117_v36, %v186_v37  ;;  %v9939_v11 = vpop.permute.xlu1 %1050 }
 0x23a   :  { %v188_v39 = vand.u32 4294901760, %v187_v38 }
 0x23c   :  { %8431 = vmatmul.mubr.f32.vlgmr.msra.gmra.mrb[0].mxu0 %v188_v39  ;;  %v189_v42 = vsub.f32 %v187_v38, %v188_v39 }
 0x23d   :  { %9091 = vmatpush3.bf16.msra.mxu0 %v9862_v29  ;;  %8437 = vmatprep.mubr.msk.f32.mxu0 %vm9750_vm1, %v9751_v21 }
 0x23e   :  { %v190_v45 = vand.u32 4294901760, %v189_v42  ;;  %9092 = vmatprep.subr.bf16.mxu0 %v9749_v20 }
 0x240   :  { %8410 = vmatmul.mubr.f32.vlgmr.msra.gmra.mrb[0].mxu1 %v190_v45 }
 0x241   :  { %9082 = vmatpush3.bf16.msra.mxu1 %v9865_v33  ;;  %8416 = vmatprep.mubr.msk.f32.mxu1 %vm9750_vm1, %v9751_v21 }
 0x242   :  { %9083 = vmatprep.subr.bf16.mxu1 %v9749_v20 }
 0x244   :  { %8438 = vmatmul.mubr.f32.vlgmr.msra.gmra.mrb[0].mxu0 %v186_v37 }
 0x245   :  { %9094 = vmatpush3.bf16.msra.mxu0 %v9850_v19  ;;  %8444 = vmatprep.mubr.msk.f32.mxu0 %vm9750_vm1, %v9751_v21 }
 0x246   :  { %9113 = vmatprep.subr.bf16.mxu0 %v9749_v20 }
 0x248   :  { %8417 = vmatmul.mubr.f32.vlgmr.msra.gmra.mrb[0].mxu1 %v186_v37 }
 0x249   :  { %9085 = vmatpush3.bf16.msra.mxu1 %v9867_v34  ;;  %8423 = vmatprep.mubr.msk.f32.mxu1 %vm9750_vm1, %v9751_v21 }
 0x24a   :  { %9095 = vmatprep.subr.bf16.mxu1 %v9749_v20 }
 0x24c   :  { %8445 = vmatmul.mubr.f32.vlgmr.msra.gmra.mrb[0].mxu0 %v186_v37 }
 0x24d   :  { %9115 = vmatpush3.bf16.msra.mxu0 %v9850_v19  ;;  %8493 = vmatprep.mubr.msk.f32.mxu0 %vm9750_vm1, %v9751_v21 }
 0x24e   :  { %9116 = vmatprep.subr.bf16.mxu0 %v9749_v20 }
 0x250   :  { %8424 = vmatmul.mubr.f32.vlgmr.msra.gmra.mrb[0].mxu1 %v187_v38 }
 0x251   :  { %9097 = vmatpush3.bf16.msra.mxu1 %v9886_v52  ;;  %8451 = vmatprep.mubr.msk.f32.mxu1 %vm9750_vm1, %v9751_v21 }
 0x252   :  { %9098 = vmatprep.subr.bf16.mxu1 %v9749_v20 }
 0x254   :  { %8452 = vmatmul.mubr.f32.vlgmr.msra.gmra.mrb[2].mxu1 %v9751_v21 }
 0x255   :  { %9100 = vmatpush3.bf16.msra.mxu1 %v9895_v55  ;;  %8458 = vmatprep.mubr.msk.f32.mxu1 %vm9750_vm1, %v9751_v21 }
 0x256   :  { %9101 = vmatprep.subr.bf16.mxu1 %v9749_v20 }
 0x25c   :  { %8459 = vmatmul.mubr.f32.vlgmr.msra.gmra.mrb[2].mxu1 %v9751_v21 }
 0x25d   :  { %9103 = vmatpush3.bf16.msra.mxu1 %v9903_v56  ;;  %8465 = vmatprep.mubr.msk.f32.mxu1 %vm9750_vm1, %v9751_v21 }
 0x25e   :  { %9104 = vmatprep.subr.bf16.mxu1 %v9749_v20 }
 0x264   :  { %8466 = vmatmul.mubr.f32.vlgmr.msra.gmra.mrb[2].mxu1 %v9751_v21 }
 0x265   :  { %9106 = vmatpush3.bf16.msra.mxu1 %v9886_v52  ;;  %8472 = vmatprep.mubr.msk.f32.mxu1 %vm9750_vm1, %v9751_v21 }
 0x266   :  { %9107 = vmatprep.subr.bf16.mxu1 %v9749_v20 }
 0x26c   :  { %8473 = vmatmul.mubr.f32.vlgmr.msra.gmra.mrb[2].mxu1 %v9751_v21 }
 0x26d   :  { %9109 = vmatpush3.bf16.msra.mxu1 %v9915_v57  ;;  %8479 = vmatprep.mubr.msk.f32.mxu1 %vm9750_vm1, %v9751_v21 }
 0x26e   :  { %9110 = vmatprep.subr.bf16.mxu1 %v9749_v20 }
 0x274   :  { %8480 = vmatmul.mubr.f32.vlgmr.msra.gmra.mrb[2].mxu1 %v9751_v21 }
 0x275   :  { %9112 = vmatpush3.bf16.msra.mxu1 %v9886_v52  ;;  %8486 = vmatprep.mubr.msk.f32.mxu1 %vm9750_vm1, %v9751_v21 }
 0x276   :  { %9131 = vmatprep.subr.bf16.mxu1 %v9749_v20 }
 0x27c   :  { %8487 = vmatmul.mubr.f32.vlgmr.msra.gmra.mrb[2].mxu1 %v9751_v21 }
 0x27d   :  { %9133 = vmatpush3.bf16.msra.mxu1 %v9886_v52  ;;  %8535 = vmatprep.mubr.msk.f32.mxu1 %vm9750_vm1, %v9751_v21 }
 0x27e   :  { %9134 = vmatprep.subr.bf16.mxu1 %v9749_v20 }
 0x31f   :  { %v574_v60 = vpop.f32.mrb[0].mxu0 }
 0x320   :  { %v8446_v62 = vpop.f32.mrb[1].mxu0 }
 0x323   :  { %v349_v0 = vpop.f32.mrb[0].mxu1 }
 0x324   :  { %v9365_v2 = vadd.f32 %v574_v60, %v349_v0  ;;  %v8425_v3 = vpop.f32.mrb[1].mxu1  ;;  %v2078_v0 = vrot.slane %v2076_v63, 7  ;;  %v3069_v63 = vld [vmem:[%s3068_s8] sm:$0x1] }
 0x326   :  { %v1088_v4 = vadd.f32 %v9365_v2, %v1087_v1  ;;  %v2073_v1 = vld [vmem:[%s2072_s28] sm:$0x1] }
 0x328   :  { %9538 = vtanh.f32 %v1088_v4  ;;  %v8091_v8 = vmul.f32 -1.442695, %v1088_v4 }
 0x32a   :  { %9540 = vpow2.f32 %v8091_v8 }
 0x332   :  { %v9539_v5 = vpop.eup %9538 }
 0x333   :  { %1098 = vrot.lane.b32.xlu1 %v9539_v5, %s9746_s3 }
 0x334   :  { %v9541_v9 = vpop.eup %9540 }
 0x335   :  { %v1092_v10 = vadd.f32 1.0, %v9541_v9 }
 0x337   :  { %9542 = vrcp.f32 %v1092_v10 }
 0x341   :  { %v9543_v12 = vpop.eup %9542 }
 0x342   :  { %v1096_v23 = vmul.f32 %v9543_v12, %v9846_v13 }
 0x34f   :  { %v1036_v6 = vpop.f32.mrb[2].mxu1 }
 0x350   :  { %1041 = vrot.lane.b32.xlu0 %v1036_v6, %s9753_s22  ;;  %v8488_v7 = vpop.f32.mrb[3].mxu1 }
 0x3a5   :  { %v1099_v14 = vpop.permute.xlu1 %1098 }
 0x3a6   :  { %v1101_v15 = vmul.f32 %v9543_v12, %v1099_v14 }
 0x3a8   :  { %1103 = vrot.lane.b32.xlu1 %v1101_v15, %s9747_s30 }
 0x3c2   :  { %v1042_v16 = vpop.permute.xlu0 %1041 }
 0x3c3   :  { %v1044_v17 = vadd.f32 %v9365_v2, %v1042_v16  ;;  %v2080_v2 = vsel %vm86_vm0, %v2073_v1, %v2078_v0  ;;  %v3071_v0 = vrot.slane %v3069_v63, 7  ;;  %v3066_v1 = vld [vmem:[%s3065_s9] sm:$0x1] }
 0x3c5   :  { %v1053_v18 = vadd.f32 %v9939_v11, %v1044_v17 }
 0x3c7   :  { %9544 = vtanh.f32 %v1053_v18  ;;  %v8088_v26 = vmul.f32 -1.442695, %v1053_v18 }
 0x3d1   :  { %v9545_v22 = vpop.eup %9544 }
 0x3d2   :  { %1063 = vrot.lane.b32.xlu0 %v9545_v22, %s9746_s3 }
 0x41a   :  { %v1104_v24 = vpop.permute.xlu1 %1103 }
 0x41b   :  { %v9945_v25 = vadd.f32 %v1104_v24, %v1096_v23 }
 0x41d   :  { %9546 = vtanh.f32 %v9945_v25 }
 0x41e   :  { %9548 = vpow2.f32 %v8088_v26 }
 0x427   :  { %v9547_v27 = vpop.eup %9546 }
 0x428   :  { %1109 = vrot.lane.b32.xlu1 %v9547_v27, %s9748_s6  ;;  %v9549_v28 = vpop.eup %9548 }
 0x429   :  { %v1057_v30 = vadd.f32 1.0, %v9549_v28 }
 0x42b   :  { %9550 = vrcp.f32 %v1057_v30 }
 0x435   :  { %v9551_v31 = vpop.eup %9550 }
 0x436   :  { %v1061_v37 = vmul.f32 0.0, %v9551_v31 }
 0x444   :  { %v1064_v32 = vpop.permute.xlu0 %1063 }
 0x445   :  { %v1066_v35 = vmul.f32 %v9551_v31, %v1064_v32 }
 0x447   :  { %1068 = vrot.lane.b32.xlu0 %v1066_v35, %s9747_s30 }
 0x49a   :  { %v1110_v36 = vpop.permute.xlu1 %1109 }
 0x49b   :  { %v1112_v13 = vmul.f32 %v9543_v12, %v1110_v36 }
 0x49d   :  { %1114 = vrot.lane.b32.xlu1 %v1112_v13, %s9752_s2 }
 0x4b9   :  { %v1069_v38 = vpop.permute.xlu0 %1068 }
 0x4ba   :  { %v9951_v39 = vadd.f32 %v1069_v38, %v1061_v37 }
 0x4bc   :  { %9552 = vtanh.f32 %v9951_v39 }
 0x4c6   :  { %v9553_v40 = vpop.eup %9552 }
 0x4c7   :  { %1074 = vrot.lane.b32.xlu0 %v9553_v40, %s9748_s6 }
 0x50f   :  { %v1115_v41 = vpop.permute.xlu1 %1114 }
 0x510   :  { %v1116_v42 = vsel %vm116_vm2, %v1115_v41, 0 }
 0x511   :  { %v1185_v43 = vand.u32 4294901760, %v1116_v42 }
 0x513   :  { %v1186_v44 = vsub.f32 %v1116_v42, %v1185_v43 }
 0x515   :  { %v1187_v45 = vand.u32 4294901760, %v1186_v44 }
 0x517   :  { %v1188_v46 = vsub.f32 %v1186_v44, %v1187_v45 }
 0x519   :  { %v1189_v47 = vand.u32 4294901760, %v1188_v46 }
 0x51b   :  { %8494 = vmatmul.mubr.f32.vlgmr.msra.gmra.mrb[2].mxu0 %v1189_v47 }
 0x51c   :  { %9118 = vmatpush3.bf16.msra.mxu0 %v9865_v33  ;;  %8500 = vmatprep.mubr.msk.f32.mxu0 %vm9750_vm1, %v9751_v21 }
 0x51d   :  { %9119 = vmatprep.subr.bf16.mxu0 %v9749_v20 }
 0x523   :  { %8501 = vmatmul.mubr.f32.vlgmr.msra.gmra.mrb[2].mxu0 %v1185_v43 }
 0x524   :  { %9121 = vmatpush3.bf16.msra.mxu0 %v9867_v34  ;;  %8507 = vmatprep.mubr.msk.f32.mxu0 %vm9750_vm1, %v9751_v21 }
 0x525   :  { %9122 = vmatprep.subr.bf16.mxu0 %v9749_v20 }
 0x52b   :  { %8508 = vmatmul.mubr.f32.vlgmr.msra.gmra.mrb[2].mxu0 %v1186_v44 }
 0x52c   :  { %9124 = vmatpush3.bf16.msra.mxu0 %v9850_v19  ;;  %8514 = vmatprep.mubr.msk.f32.mxu0 %vm9750_vm1, %v9751_v21 }
 0x52d   :  { %9125 = vmatprep.subr.bf16.mxu0 %v9749_v20 }
 0x533   :  { %8515 = vmatmul.mubr.f32.vlgmr.msra.gmra.mrb[2].mxu0 %v1187_v45 }
 0x534   :  { %9127 = vmatpush3.bf16.msra.mxu0 %v9862_v29  ;;  %8521 = vmatprep.mubr.msk.f32.mxu0 %vm9750_vm1, %v9751_v21 }
 0x535   :  { %9128 = vmatprep.subr.bf16.mxu0 %v9749_v20 }
 0x539   :  { %v1075_v48 = vpop.permute.xlu0 %1074 }
 0x53a   :  { %v1077_v49 = vmul.f32 %v9551_v31, %v1075_v48 }
 0x53b   :  { %8522 = vmatmul.mubr.f32.vlgmr.msra.gmra.mrb[2].mxu0 %v1185_v43 }
 0x53c   :  { %1578 = vrot.lane.b32.xlu0 %v1077_v49, %s9747_s30  ;;  %9130 = vmatpush3.bf16.msra.mxu0 %v9850_v19 }
 0x53d   :  { %8528 = vmatprep.mubr.msk.f32.mxu0 %vm9750_vm1, %v9751_v21  ;;  %9149 = vmatprep.subr.bf16.mxu0 %v9749_v20 }
 0x543   :  { %8529 = vmatmul.mubr.f32.vlgmr.msra.gmra.mrb[2].mxu0 %v1185_v43 }
 0x544   :  { %9151 = vmatpush3.bf16.msra.mxu0 %v9850_v19  ;;  %8577 = vmatprep.mubr.msk.f32.mxu0 %vm9750_vm1, %v9751_v21 }
 0x545   :  { %9152 = vmatprep.subr.bf16.mxu0 %v9749_v20 }
 0x5ae   :  { %v9981_v50 = vpop.permute.xlu0 %1578 }
 0x5af   :  { %v1580_v51 = vsel %vm116_vm2, %v9981_v50, 0 }
 0x5b0   :  { %v1649_v53 = vand.u32 4294901760, %v1580_v51 }
 0x5b2   :  { %v1650_v54 = vsub.f32 %v1580_v51, %v1649_v53 }
 0x5b4   :  { %v1651_v58 = vand.u32 4294901760, %v1650_v54 }
 0x5b6   :  { %v1652_v59 = vsub.f32 %v1650_v54, %v1651_v58 }
 0x5b8   :  { %v1653_v60 = vand.u32 4294901760, %v1652_v59 }
 0x5ba   :  { %8536 = vmatmul.mubr.f32.vlgmr.msra.gmra.mrb[4].mxu1 %v1653_v60 }
 0x5bb   :  { %9136 = vmatpush3.bf16.msra.mxu1 %v9895_v55  ;;  %8542 = vmatprep.mubr.msk.f32.mxu1 %vm9750_vm1, %v9751_v21 }
 0x5bc   :  { %9137 = vmatprep.subr.bf16.mxu1 %v9749_v20 }
 0x5c2   :  { %8543 = vmatmul.mubr.f32.vlgmr.msra.gmra.mrb[4].mxu1 %v1649_v53 }
 0x5c3   :  { %9139 = vmatpush3.bf16.msra.mxu1 %v9903_v56  ;;  %8549 = vmatprep.mubr.msk.f32.mxu1 %vm9750_vm1, %v9751_v21 }
 0x5c4   :  { %9140 = vmatprep.subr.bf16.mxu1 %v9749_v20 }
 0x5ca   :  { %8550 = vmatmul.mubr.f32.vlgmr.msra.gmra.mrb[4].mxu1 %v1650_v54 }
 0x5cb   :  { %9142 = vmatpush3.bf16.msra.mxu1 %v9886_v52  ;;  %8556 = vmatprep.mubr.msk.f32.mxu1 %vm9750_vm1, %v9751_v21 }
 0x5cc   :  { %9143 = vmatprep.subr.bf16.mxu1 %v9749_v20 }
 0x5d2   :  { %8557 = vmatmul.mubr.f32.vlgmr.msra.gmra.mrb[4].mxu1 %v1651_v58 }
 0x5d3   :  { %9145 = vmatpush3.bf16.msra.mxu1 %v9915_v57  ;;  %8563 = vmatprep.mubr.msk.f32.mxu1 %vm9750_vm1, %v9751_v21 }
 0x5d4   :  { %9146 = vmatprep.subr.bf16.mxu1 %v9749_v20 }
 0x5da   :  { %8564 = vmatmul.mubr.f32.vlgmr.msra.gmra.mrb[4].mxu1 %v1649_v53 }
 0x5db   :  { %9148 = vmatpush3.bf16.msra.mxu1 %v9886_v52  ;;  %8570 = vmatprep.mubr.msk.f32.mxu1 %vm9750_vm1, %v9751_v21 }
 0x5dc   :  { %9167 = vmatprep.subr.bf16.mxu1 %v9749_v20 }
 0x5e2   :  { %8571 = vmatmul.mubr.f32.vlgmr.msra.gmra.mrb[4].mxu1 %v1649_v53 }
 0x5e3   :  { %9169 = vmatpush3.bf16.msra.mxu1 %v9886_v52  ;;  %8619 = vmatprep.mubr.msk.f32.mxu1 %vm9750_vm1, %v9751_v21 }
 0x5e4   :  { %9170 = vmatprep.subr.bf16.mxu1 %v9749_v20 }
 0x616   :  { %v1573_v61 = vpop.f32.mrb[2].mxu0 }
 0x617   :  { %v8530_v62 = vpop.f32.mrb[3].mxu0  ;;  %v2081_v3 = vadd.f32 %v2080_v2, %v1573_v61  ;;  %v3073_v2 = vsel %vm86_vm0, %v3066_v1, %v3071_v0  ;;  %v4062_v0 = vld [vmem:[%s4061_s12] sm:$0x1] }
 0x618   :  { %v4064_v1 = vrot.slane %v4062_v0, 7 }
 0x619   :  { %9554 = vtanh.f32 %v2081_v3  ;;  %v8095_v7 = vmul.f32 -1.442695, %v2081_v3 }
 0x61b   :  { %9556 = vpow2.f32 %v8095_v7 }
 0x623   :  { %v9555_v6 = vpop.eup %9554 }
 0x625   :  { %v9557_v8 = vpop.eup %9556 }
 0x626   :  { %v2085_v9 = vadd.f32 1.0, %v9557_v8 }
 0x628   :  { %9558 = vrcp.f32 %v2085_v9 }
 0x632   :  { %v9559_v15 = vpop.eup %9558 }
 0x633   :  { %v2089_v26 = vmul.f32 %v9559_v15, %v9945_v25 }
 0x6b5   :  { %v2037_v4 = vpop.f32.mrb[4].mxu1 }
 0x6b6   :  { %2042 = vrot.lane.b32.xlu0 %v2037_v4, %s9753_s22  ;;  %v8572_v5 = vpop.f32.mrb[5].mxu1 }
 0x6ba   :  { %2091 = vrot.lane.b32.xlu0 %v9555_v6, %s9746_s3 }
 0x728   :  { %v2043_v10 = vpop.permute.xlu0 %2042 }
 0x729   :  { %v2045_v12 = vadd.f32 %v2043_v10, %v1573_v61 }
 0x72b   :  { %v2046_v14 = vadd.f32 %v2045_v12, %v9939_v11 }
 0x72c   :  { %v2092_v16 = vpop.permute.xlu0 %2091 }
 0x72d   :  { %9560 = vtanh.f32 %v2046_v14  ;;  %v2094_v17 = vmul.f32 %v9559_v15, %v2092_v16  ;;  %v8092_v22 = vmul.f32 -1.442695, %v2046_v14 }
 0x72f   :  { %2096 = vrot.lane.b32.xlu0 %v2094_v17, %s9747_s30  ;;  %9562 = vpow2.f32 %v8092_v22 }
 0x737   :  { %v9561_v18 = vpop.eup %9560 }
 0x738   :  { %2056 = vrot.lane.b32.xlu1 %v9561_v18, %s9746_s3 }
 0x739   :  { %v9563_v23 = vpop.eup %9562 }
 0x73a   :  { %v2050_v24 = vadd.f32 1.0, %v9563_v23 }
 0x73c   :  { %9564 = vrcp.f32 %v2050_v24 }
 0x746   :  { %v9565_v30 = vpop.eup %9564 }
 0x747   :  { %v2054_v36 = vmul.f32 %v9565_v30, %v9951_v39 }
 0x7a1   :  { %v2097_v27 = vpop.permute.xlu0 %2096 }
 0x7a2   :  { %v10016_v28 = vadd.f32 %v2097_v27, %v2089_v26 }
 0x7a4   :  { %9566 = vtanh.f32 %v10016_v28 }
 0x7aa   :  { %v2057_v31 = vpop.permute.xlu1 %2056 }
 0x7ab   :  { %v2059_v32 = vmul.f32 %v9565_v30, %v2057_v31 }
 0x7ad   :  { %2061 = vrot.lane.b32.xlu1 %v2059_v32, %s9747_s30 }
 0x7ae   :  { %v9567_v35 = vpop.eup %9566 }
 0x7af   :  { %2102 = vrot.lane.b32.xlu0 %v9567_v35, %s9748_s6 }
 0x81f   :  { %v2062_v13 = vpop.permute.xlu1 %2061 }
 0x820   :  { %v10022_v37 = vadd.f32 %v2062_v13, %v2054_v36 }
 0x821   :  { %v2103_v38 = vpop.permute.xlu0 %2102 }
 0x822   :  { %9568 = vtanh.f32 %v10022_v37  ;;  %v2105_v25 = vmul.f32 %v9559_v15, %v2103_v38 }
 0x824   :  { %2107 = vrot.lane.b32.xlu0 %v2105_v25, %s9752_s2 }
 0x82c   :  { %v9569_v40 = vpop.eup %9568 }
 0x82d   :  { %2067 = vrot.lane.b32.xlu1 %v9569_v40, %s9748_s6 }
 0x896   :  { %v2108_v41 = vpop.permute.xlu0 %2107 }
 0x897   :  { %v2109_v42 = vsel %vm116_vm2, %v2108_v41, 0 }
 0x898   :  { %v2178_v43 = vand.u32 4294901760, %v2109_v42 }
 0x89a   :  { %v2179_v44 = vsub.f32 %v2109_v42, %v2178_v43 }
 0x89c   :  { %v2180_v45 = vand.u32 4294901760, %v2179_v44 }
 0x89e   :  { %v2181_v46 = vsub.f32 %v2179_v44, %v2180_v45 }
 0x89f   :  { %v2068_v39 = vpop.permute.xlu1 %2067 }
 0x8a0   :  { %v2182_v47 = vand.u32 4294901760, %v2181_v46  ;;  %v10028_v48 = vmul.f32 %v9565_v30, %v2068_v39 }
 0x8a2   :  { %2571 = vrot.lane.b32.xlu1 %v10028_v48, %s9747_s30  ;;  %8578 = vmatmul.mubr.f32.vlgmr.msra.gmra.mrb[4].mxu0 %v2182_v47 }
 0x8a3   :  { %9154 = vmatpush3.bf16.msra.mxu0 %v9865_v33  ;;  %8584 = vmatprep.mubr.msk.f32.mxu0 %vm9750_vm1, %v9751_v21 }
 0x8a4   :  { %9155 = vmatprep.subr.bf16.mxu0 %v9749_v20 }
 0x8aa   :  { %8585 = vmatmul.mubr.f32.vlgmr.msra.gmra.mrb[4].mxu0 %v2178_v43 }
 0x8ab   :  { %9157 = vmatpush3.bf16.msra.mxu0 %v9867_v34  ;;  %8591 = vmatprep.mubr.msk.f32.mxu0 %vm9750_vm1, %v9751_v21 }
 0x8ac   :  { %9158 = vmatprep.subr.bf16.mxu0 %v9749_v20 }
 0x8b2   :  { %8592 = vmatmul.mubr.f32.vlgmr.msra.gmra.mrb[4].mxu0 %v2179_v44 }
 0x8b3   :  { %9160 = vmatpush3.bf16.msra.mxu0 %v9850_v19  ;;  %8598 = vmatprep.mubr.msk.f32.mxu0 %vm9750_vm1, %v9751_v21 }
 0x8b4   :  { %9161 = vmatprep.subr.bf16.mxu0 %v9749_v20 }
 0x8ba   :  { %8599 = vmatmul.mubr.f32.vlgmr.msra.gmra.mrb[4].mxu0 %v2180_v45 }
 0x8bb   :  { %9163 = vmatpush3.bf16.msra.mxu0 %v9862_v29  ;;  %8605 = vmatprep.mubr.msk.f32.mxu0 %vm9750_vm1, %v9751_v21 }
 0x8bc   :  { %9164 = vmatprep.subr.bf16.mxu0 %v9749_v20 }
 0x8c2   :  { %8606 = vmatmul.mubr.f32.vlgmr.msra.gmra.mrb[4].mxu0 %v2178_v43 }
 0x8c3   :  { %9166 = vmatpush3.bf16.msra.mxu0 %v9850_v19  ;;  %8612 = vmatprep.mubr.msk.f32.mxu0 %vm9750_vm1, %v9751_v21 }
 0x8c4   :  { %9185 = vmatprep.subr.bf16.mxu0 %v9749_v20 }
 0x8ca   :  { %8613 = vmatmul.mubr.f32.vlgmr.msra.gmra.mrb[4].mxu0 %v2178_v43 }
 0x8cb   :  { %9187 = vmatpush3.bf16.msra.mxu0 %v9850_v19  ;;  %8661 = vmatprep.mubr.msk.f32.mxu0 %vm9750_vm1, %v9751_v21 }
 0x8cc   :  { %9188 = vmatprep.subr.bf16.mxu0 %v9749_v20 }
 0x914   :  { %v2572_v49 = vpop.permute.xlu1 %2571 }
 0x915   :  { %v2573_v51 = vsel %vm116_vm2, %v2572_v49, 0 }
 0x916   :  { %v2642_v53 = vand.u32 4294901760, %v2573_v51 }
 0x918   :  { %v2643_v54 = vsub.f32 %v2573_v51, %v2642_v53 }
 0x91a   :  { %v2644_v58 = vand.u32 4294901760, %v2643_v54 }
 0x91c   :  { %v2645_v59 = vsub.f32 %v2643_v54, %v2644_v58 }
 0x91e   :  { %v2646_v60 = vand.u32 4294901760, %v2645_v59 }
 0x920   :  { %8620 = vmatmul.mubr.f32.vlgmr.msra.gmra.mrb[6].mxu1 %v2646_v60 }
 0x921   :  { %9172 = vmatpush3.bf16.msra.mxu1 %v9895_v55  ;;  %8626 = vmatprep.mubr.msk.f32.mxu1 %vm9750_vm1, %v9751_v21 }
 0x922   :  { %9173 = vmatprep.subr.bf16.mxu1 %v9749_v20 }
 0x928   :  { %8627 = vmatmul.mubr.f32.vlgmr.msra.gmra.mrb[6].mxu1 %v2642_v53 }
 0x929   :  { %9175 = vmatpush3.bf16.msra.mxu1 %v9903_v56  ;;  %8633 = vmatprep.mubr.msk.f32.mxu1 %vm9750_vm1, %v9751_v21 }
 0x92a   :  { %9176 = vmatprep.subr.bf16.mxu1 %v9749_v20 }
 0x930   :  { %8634 = vmatmul.mubr.f32.vlgmr.msra.gmra.mrb[6].mxu1 %v2643_v54 }
 0x931   :  { %9178 = vmatpush3.bf16.msra.mxu1 %v9886_v52  ;;  %8640 = vmatprep.mubr.msk.f32.mxu1 %vm9750_vm1, %v9751_v21 }
 0x932   :  { %9179 = vmatprep.subr.bf16.mxu1 %v9749_v20 }
 0x938   :  { %8641 = vmatmul.mubr.f32.vlgmr.msra.gmra.mrb[6].mxu1 %v2644_v58 }
 0x939   :  { %9181 = vmatpush3.bf16.msra.mxu1 %v9915_v57  ;;  %8647 = vmatprep.mubr.msk.f32.mxu1 %vm9750_vm1, %v9751_v21 }
 0x93a   :  { %9182 = vmatprep.subr.bf16.mxu1 %v9749_v20 }
 0x940   :  { %8648 = vmatmul.mubr.f32.vlgmr.msra.gmra.mrb[6].mxu1 %v2642_v53 }
 0x941   :  { %9184 = vmatpush3.bf16.msra.mxu1 %v9886_v52  ;;  %8654 = vmatprep.mubr.msk.f32.mxu1 %vm9750_vm1, %v9751_v21 }
 0x942   :  { %9203 = vmatprep.subr.bf16.mxu1 %v9749_v20 }
 0x948   :  { %8655 = vmatmul.mubr.f32.vlgmr.msra.gmra.mrb[6].mxu1 %v2642_v53 }
 0x949   :  { %9205 = vmatpush3.bf16.msra.mxu1 %v9886_v52  ;;  %8703 = vmatprep.mubr.msk.f32.mxu1 %vm9750_vm1, %v9751_v21 }
 0x94a   :  { %9206 = vmatprep.subr.bf16.mxu1 %v9749_v20 }
 0x99d   :  { %v2566_v61 = vpop.f32.mrb[4].mxu0 }
 0x99e   :  { %v8614_v62 = vpop.f32.mrb[5].mxu0  ;;  %v3074_v3 = vadd.f32 %v3073_v2, %v2566_v61  ;;  %v4059_v2 = vld [vmem:[%s4058_s13] sm:$0x1] }
 0x9a0   :  { %9570 = vtanh.f32 %v3074_v3  ;;  %v8099_v7 = vmul.f32 -1.442695, %v3074_v3  ;;  %v4066_v3 = vsel %vm86_vm0, %v4059_v2, %v4064_v1  ;;  %v5055_v2 = vld [vmem:[%s5054_s21] sm:$0x1] }
 0x9a2   :  { %9572 = vpow2.f32 %v8099_v7 }
 0x9aa   :  { %v9571_v6 = vpop.eup %9570 }
 0x9ac   :  { %v9573_v8 = vpop.eup %9572 }
 0x9ad   :  { %v3078_v9 = vadd.f32 1.0, %v9573_v8 }
 0x9af   :  { %9574 = vrcp.f32 %v3078_v9 }
 0x9b9   :  { %v9575_v15 = vpop.eup %9574 }
 0x9ba   :  { %v3082_v26 = vmul.f32 %v9575_v15, %v10016_v28 }
 0xa1b   :  { %v3030_v4 = vpop.f32.mrb[6].mxu1 }
 0xa1c   :  { %3035 = vrot.lane.b32.xlu1 %v3030_v4, %s9753_s22  ;;  %v8656_v5 = vpop.f32.mrb[7].mxu1 }
 0xa20   :  { %3084 = vrot.lane.b32.xlu1 %v9571_v6, %s9746_s3 }
 0xa8e   :  { %v3036_v10 = vpop.permute.xlu1 %3035 }
 0xa8f   :  { %v3038_v12 = vadd.f32 %v3036_v10, %v2566_v61 }
 0xa91   :  { %v3039_v14 = vadd.f32 %v3038_v12, %v9939_v11 }
 0xa92   :  { %v3085_v16 = vpop.permute.xlu1 %3084 }
 0xa93   :  { %9576 = vtanh.f32 %v3039_v14  ;;  %v3087_v17 = vmul.f32 %v9575_v15, %v3085_v16  ;;  %v8096_v22 = vmul.f32 -1.442695, %v3039_v14 }
 0xa95   :  { %3089 = vrot.lane.b32.xlu1 %v3087_v17, %s9747_s30  ;;  %9578 = vpow2.f32 %v8096_v22 }
 0xa9d   :  { %v9577_v18 = vpop.eup %9576 }
 0xa9e   :  { %3049 = vrot.lane.b32.xlu0 %v9577_v18, %s9746_s3 }
 0xa9f   :  { %v9579_v23 = vpop.eup %9578 }
 0xaa0   :  { %v3043_v24 = vadd.f32 1.0, %v9579_v23 }
 0xaa2   :  { %9580 = vrcp.f32 %v3043_v24 }
 0xaac   :  { %v9581_v31 = vpop.eup %9580 }
 0xaad   :  { %v3047_v13 = vmul.f32 %v9581_v31, %v10022_v37 }
 0xb07   :  { %v3090_v27 = vpop.permute.xlu1 %3089 }
 0xb08   :  { %v10088_v30 = vadd.f32 %v3090_v27, %v3082_v26 }
 0xb0a   :  { %9582 = vtanh.f32 %v10088_v30 }
 0xb10   :  { %v3050_v32 = vpop.permute.xlu0 %3049 }
 0xb11   :  { %v3052_v35 = vmul.f32 %v9581_v31, %v3050_v32 }
 0xb13   :  { %3054 = vrot.lane.b32.xlu0 %v3052_v35, %s9747_s30 }
 0xb14   :  { %v9583_v36 = vpop.eup %9582 }
 0xb15   :  { %3095 = vrot.lane.b32.xlu1 %v9583_v36, %s9748_s6 }
 0xb85   :  { %v3055_v38 = vpop.permute.xlu0 %3054 }
 0xb86   :  { %v10094_v25 = vadd.f32 %v3055_v38, %v3047_v13 }
 0xb87   :  { %v3096_v40 = vpop.permute.xlu1 %3095 }
 0xb88   :  { %9584 = vtanh.f32 %v10094_v25  ;;  %v3098_v28 = vmul.f32 %v9575_v15, %v3096_v40 }
 0xb8a   :  { %3100 = vrot.lane.b32.xlu1 %v3098_v28, %s9752_s2 }
 0xb92   :  { %v9585_v41 = vpop.eup %9584 }
 0xb93   :  { %3060 = vrot.lane.b32.xlu0 %v9585_v41, %s9748_s6 }
 0xbfc   :  { %v3101_v42 = vpop.permute.xlu1 %3100 }
 0xbfd   :  { %v3102_v43 = vsel %vm116_vm2, %v3101_v42, 0 }
 0xbfe   :  { %v3171_v44 = vand.u32 4294901760, %v3102_v43 }
 0xc00   :  { %v3172_v45 = vsub.f32 %v3102_v43, %v3171_v44 }
 0xc02   :  { %v3173_v46 = vand.u32 4294901760, %v3172_v45 }
 0xc04   :  { %v3174_v39 = vsub.f32 %v3172_v45, %v3173_v46 }
 0xc05   :  { %v3061_v37 = vpop.permute.xlu0 %3060 }
 0xc06   :  { %v3175_v47 = vand.u32 4294901760, %v3174_v39  ;;  %v10100_v49 = vmul.f32 %v9581_v31, %v3061_v37 }
 0xc08   :  { %3564 = vrot.lane.b32.xlu0 %v10100_v49, %s9747_s30  ;;  %8662 = vmatmul.mubr.f32.vlgmr.msra.gmra.mrb[6].mxu0 %v3175_v47 }
 0xc09   :  { %9190 = vmatpush3.bf16.msra.mxu0 %v9865_v33  ;;  %8668 = vmatprep.mubr.msk.f32.mxu0 %vm9750_vm1, %v9751_v21 }
 0xc0a   :  { %9191 = vmatprep.subr.bf16.mxu0 %v9749_v20 }
 0xc10   :  { %8669 = vmatmul.mubr.f32.vlgmr.msra.gmra.mrb[6].mxu0 %v3171_v44 }
 0xc11   :  { %9193 = vmatpush3.bf16.msra.mxu0 %v9867_v34  ;;  %8675 = vmatprep.mubr.msk.f32.mxu0 %vm9750_vm1, %v9751_v21 }
 0xc12   :  { %9194 = vmatprep.subr.bf16.mxu0 %v9749_v20 }
 0xc18   :  { %8676 = vmatmul.mubr.f32.vlgmr.msra.gmra.mrb[6].mxu0 %v3172_v45 }
 0xc19   :  { %9196 = vmatpush3.bf16.msra.mxu0 %v9850_v19  ;;  %8682 = vmatprep.mubr.msk.f32.mxu0 %vm9750_vm1, %v9751_v21 }
 0xc1a   :  { %9197 = vmatprep.subr.bf16.mxu0 %v9749_v20 }
 0xc20   :  { %8683 = vmatmul.mubr.f32.vlgmr.msra.gmra.mrb[6].mxu0 %v3173_v46 }
 0xc21   :  { %9199 = vmatpush3.bf16.msra.mxu0 %v9862_v29  ;;  %8689 = vmatprep.mubr.msk.f32.mxu0 %vm9750_vm1, %v9751_v21 }
 0xc22   :  { %9200 = vmatprep.subr.bf16.mxu0 %v9749_v20 }
 0xc28   :  { %8690 = vmatmul.mubr.f32.vlgmr.msra.gmra.mrb[6].mxu0 %v3171_v44 }
 0xc29   :  { %9202 = vmatpush3.bf16.msra.mxu0 %v9850_v19  ;;  %8696 = vmatprep.mubr.msk.f32.mxu0 %vm9750_vm1, %v9751_v21 }
 0xc2a   :  { %9221 = vmatprep.subr.bf16.mxu0 %v9749_v20 }
 0xc30   :  { %8697 = vmatmul.mubr.f32.vlgmr.msra.gmra.mrb[6].mxu0 %v3171_v44 }
 0xc31   :  { %9223 = vmatpush3.bf16.msra.mxu0 %v9850_v19  ;;  %8745 = vmatprep.mubr.msk.f32.mxu0 %vm9750_vm1, %v9751_v21 }
 0xc32   :  { %9224 = vmatprep.subr.bf16.mxu0 %v9749_v20 }
 0xc7a   :  { %v3565_v51 = vpop.permute.xlu0 %3564 }
 0xc7b   :  { %v3566_v53 = vsel %vm116_vm2, %v3565_v51, 0 }
 0xc7c   :  { %v3635_v54 = vand.u32 4294901760, %v3566_v53 }
 0xc7e   :  { %v3636_v58 = vsub.f32 %v3566_v53, %v3635_v54 }
 0xc80   :  { %v3637_v59 = vand.u32 4294901760, %v3636_v58 }
 0xc82   :  { %v3638_v60 = vsub.f32 %v3636_v58, %v3637_v59 }
 0xc84   :  { %v3639_v61 = vand.u32 4294901760, %v3638_v60 }
 0xc86   :  { %8704 = vmatmul.mubr.f32.vlgmr.msra.gmra.mrb[8].mxu1 %v3639_v61 }
 0xc87   :  { %9208 = vmatpush3.bf16.msra.mxu1 %v9895_v55  ;;  %8710 = vmatprep.mubr.msk.f32.mxu1 %vm9750_vm1, %v9751_v21 }
 0xc88   :  { %9209 = vmatprep.subr.bf16.mxu1 %v9749_v20 }
 0xc8e   :  { %8711 = vmatmul.mubr.f32.vlgmr.msra.gmra.mrb[8].mxu1 %v3635_v54 }
 0xc8f   :  { %9211 = vmatpush3.bf16.msra.mxu1 %v9903_v56  ;;  %8717 = vmatprep.mubr.msk.f32.mxu1 %vm9750_vm1, %v9751_v21 }
 0xc90   :  { %9212 = vmatprep.subr.bf16.mxu1 %v9749_v20 }
 0xc96   :  { %8718 = vmatmul.mubr.f32.vlgmr.msra.gmra.mrb[8].mxu1 %v3636_v58 }
 0xc97   :  { %9214 = vmatpush3.bf16.msra.mxu1 %v9886_v52  ;;  %8724 = vmatprep.mubr.msk.f32.mxu1 %vm9750_vm1, %v9751_v21 }
 0xc98   :  { %9215 = vmatprep.subr.bf16.mxu1 %v9749_v20 }
 0xc9e   :  { %8725 = vmatmul.mubr.f32.vlgmr.msra.gmra.mrb[8].mxu1 %v3637_v59 }
 0xc9f   :  { %9217 = vmatpush3.bf16.msra.mxu1 %v9915_v57  ;;  %8731 = vmatprep.mubr.msk.f32.mxu1 %vm9750_vm1, %v9751_v21 }
 0xca0   :  { %9218 = vmatprep.subr.bf16.mxu1 %v9749_v20 }
 0xca6   :  { %8732 = vmatmul.mubr.f32.vlgmr.msra.gmra.mrb[8].mxu1 %v3635_v54 }
 0xca7   :  { %9220 = vmatpush3.bf16.msra.mxu1 %v9886_v52  ;;  %8738 = vmatprep.mubr.msk.f32.mxu1 %vm9750_vm1, %v9751_v21 }
 0xca8   :  { %9239 = vmatprep.subr.bf16.mxu1 %v9749_v20 }
 0xcae   :  { %8739 = vmatmul.mubr.f32.vlgmr.msra.gmra.mrb[8].mxu1 %v3635_v54 }
 0xcaf   :  { %9241 = vmatpush3.bf16.msra.mxu1 %v9886_v52  ;;  %8787 = vmatprep.mubr.msk.f32.mxu1 %vm9750_vm1, %v9751_v21 }
 0xcb0   :  { %9242 = vmatprep.subr.bf16.mxu1 %v9749_v20 }
 0xd03   :  { %v3559_v62 = vpop.f32.mrb[6].mxu0 }
 0xd04   :  { %v8698_v63 = vpop.f32.mrb[7].mxu0  ;;  %v4067_v4 = vadd.f32 %v4066_v3, %v3559_v62  ;;  %v5057_v3 = vrot.slane %v5055_v2, 7 }
 0xd06   :  { %9586 = vtanh.f32 %v4067_v4  ;;  %v8103_v8 = vmul.f32 -1.442695, %v4067_v4  ;;  %v5052_v4 = vld [vmem:[%s5051_s15] sm:$0x1] }
 0xd08   :  { %9588 = vpow2.f32 %v8103_v8 }
 0xd10   :  { %v9587_v7 = vpop.eup %9586 }
 0xd12   :  { %v9589_v9 = vpop.eup %9588 }
 0xd13   :  { %v4071_v10 = vadd.f32 1.0, %v9589_v9 }
 0xd15   :  { %9590 = vrcp.f32 %v4071_v10 }
 0xd1f   :  { %v9591_v16 = vpop.eup %9590 }
 0xd20   :  { %v4075_v27 = vmul.f32 %v9591_v16, %v10088_v30 }
 0xd81   :  { %v4023_v5 = vpop.f32.mrb[8].mxu1 }
 0xd82   :  { %4028 = vrot.lane.b32.xlu0 %v4023_v5, %s9753_s22  ;;  %v8740_v6 = vpop.f32.mrb[9].mxu1  ;;  %v5059_v5 = vsel %vm86_vm0, %v5052_v4, %v5057_v3 }
 0xd86   :  { %4077 = vrot.lane.b32.xlu0 %v9587_v7, %s9746_s3 }
 0xdf4   :  { %v4029_v12 = vpop.permute.xlu0 %4028 }
 0xdf5   :  { %v4031_v14 = vadd.f32 %v4029_v12, %v3559_v62 }
 0xdf7   :  { %v4032_v15 = vadd.f32 %v4031_v14, %v9939_v11 }
 0xdf8   :  { %v4078_v17 = vpop.permute.xlu0 %4077 }
 0xdf9   :  { %9592 = vtanh.f32 %v4032_v15  ;;  %v4080_v18 = vmul.f32 %v9591_v16, %v4078_v17  ;;  %v8100_v23 = vmul.f32 -1.442695, %v4032_v15 }
 0xdfb   :  { %4082 = vrot.lane.b32.xlu0 %v4080_v18, %s9747_s30  ;;  %9594 = vpow2.f32 %v8100_v23 }
 0xe03   :  { %v9593_v22 = vpop.eup %9592 }
 0xe04   :  { %4042 = vrot.lane.b32.xlu1 %v9593_v22, %s9746_s3 }
 0xe05   :  { %v9595_v24 = vpop.eup %9594 }
 0xe06   :  { %v4036_v26 = vadd.f32 1.0, %v9595_v24 }
 0xe08   :  { %9596 = vrcp.f32 %v4036_v26 }
 0xe12   :  { %v9597_v35 = vpop.eup %9596 }
 0xe13   :  { %v4040_v40 = vmul.f32 %v9597_v35, %v10094_v25 }
 0xe6d   :  { %v4083_v31 = vpop.permute.xlu0 %4082 }
 0xe6e   :  { %v10160_v32 = vadd.f32 %v4083_v31, %v4075_v27 }
 0xe70   :  { %9598 = vtanh.f32 %v10160_v32 }
 0xe76   :  { %v4043_v36 = vpop.permute.xlu1 %4042 }
 0xe77   :  { %v4045_v13 = vmul.f32 %v9597_v35, %v4043_v36 }
 0xe79   :  { %4047 = vrot.lane.b32.xlu1 %v4045_v13, %s9747_s30 }
 0xe7a   :  { %v9599_v38 = vpop.eup %9598 }
 0xe7b   :  { %4088 = vrot.lane.b32.xlu0 %v9599_v38, %s9748_s6 }
 0xeeb   :  { %v4048_v28 = vpop.permute.xlu1 %4047 }
 0xeec   :  { %v10166_v41 = vadd.f32 %v4048_v28, %v4040_v40 }
 0xeed   :  { %v4089_v42 = vpop.permute.xlu0 %4088 }
 0xeee   :  { %9600 = vtanh.f32 %v10166_v41  ;;  %v4091_v30 = vmul.f32 %v9591_v16, %v4089_v42 }
 0xef0   :  { %4093 = vrot.lane.b32.xlu0 %v4091_v30, %s9752_s2 }
 0xef8   :  { %v9601_v43 = vpop.eup %9600 }
 0xef9   :  { %4053 = vrot.lane.b32.xlu1 %v9601_v43, %s9748_s6 }
 0xf62   :  { %v4094_v44 = vpop.permute.xlu0 %4093 }
 0xf63   :  { %v4095_v45 = vsel %vm116_vm2, %v4094_v44, 0 }
 0xf64   :  { %v4164_v46 = vand.u32 4294901760, %v4095_v45 }
 0xf66   :  { %v4165_v39 = vsub.f32 %v4095_v45, %v4164_v46 }
 0xf68   :  { %v4166_v37 = vand.u32 4294901760, %v4165_v39 }
 0xf6a   :  { %v4167_v47 = vsub.f32 %v4165_v39, %v4166_v37 }
 0xf6b   :  { %v4054_v25 = vpop.permute.xlu1 %4053 }
 0xf6c   :  { %v4168_v51 = vand.u32 4294901760, %v4167_v47  ;;  %v10172_v53 = vmul.f32 %v9597_v35, %v4054_v25 }
 0xf6e   :  { %4557 = vrot.lane.b32.xlu1 %v10172_v53, %s9747_s30  ;;  %8746 = vmatmul.mubr.f32.vlgmr.msra.gmra.mrb[8].mxu0 %v4168_v51 }
 0xf6f   :  { %9226 = vmatpush3.bf16.msra.mxu0 %v9865_v33  ;;  %8752 = vmatprep.mubr.msk.f32.mxu0 %vm9750_vm1, %v9751_v21 }
 0xf70   :  { %9227 = vmatprep.subr.bf16.mxu0 %v9749_v20 }
 0xf76   :  { %8753 = vmatmul.mubr.f32.vlgmr.msra.gmra.mrb[8].mxu0 %v4164_v46 }
 0xf77   :  { %9229 = vmatpush3.bf16.msra.mxu0 %v9867_v34  ;;  %8759 = vmatprep.mubr.msk.f32.mxu0 %vm9750_vm1, %v9751_v21 }
 0xf78   :  { %9230 = vmatprep.subr.bf16.mxu0 %v9749_v20 }
 0xf7e   :  { %8760 = vmatmul.mubr.f32.vlgmr.msra.gmra.mrb[8].mxu0 %v4165_v39 }
 0xf7f   :  { %9232 = vmatpush3.bf16.msra.mxu0 %v9850_v19  ;;  %8766 = vmatprep.mubr.msk.f32.mxu0 %vm9750_vm1, %v9751_v21 }
 0xf80   :  { %9233 = vmatprep.subr.bf16.mxu0 %v9749_v20 }
 0xf86   :  { %8767 = vmatmul.mubr.f32.vlgmr.msra.gmra.mrb[8].mxu0 %v4166_v37 }
 0xf87   :  { %9235 = vmatpush3.bf16.msra.mxu0 %v9862_v29  ;;  %8773 = vmatprep.mubr.msk.f32.mxu0 %vm9750_vm1, %v9751_v21 }
 0xf88   :  { %9236 = vmatprep.subr.bf16.mxu0 %v9749_v20 }
 0xf8e   :  { %8774 = vmatmul.mubr.f32.vlgmr.msra.gmra.mrb[8].mxu0 %v4164_v46 }
 0xf8f   :  { %9238 = vmatpush3.bf16.msra.mxu0 %v9850_v19  ;;  %8780 = vmatprep.mubr.msk.f32.mxu0 %vm9750_vm1, %v9751_v21 }
 0xf90   :  { %9257 = vmatprep.subr.bf16.mxu0 %v9749_v20 }
 0xf96   :  { %8781 = vmatmul.mubr.f32.vlgmr.msra.gmra.mrb[8].mxu0 %v4164_v46 }
 0xf97   :  { %9259 = vmatpush3.bf16.msra.mxu0 %v9850_v19  ;;  %8829 = vmatprep.mubr.msk.f32.mxu0 %vm9750_vm1, %v9751_v21 }
 0xf98   :  { %9260 = vmatprep.subr.bf16.mxu0 %v9749_v20 }
 0xfe0   :  { %v4558_v54 = vpop.permute.xlu1 %4557 }
 0xfe1   :  { %v4559_v58 = vsel %vm116_vm2, %v4558_v54, 0 }
 0xfe2   :  { %v4628_v59 = vand.u32 4294901760, %v4559_v58 }
 0xfe4   :  { %v4629_v60 = vsub.f32 %v4559_v58, %v4628_v59 }
 0xfe6   :  { %v4630_v61 = vand.u32 4294901760, %v4629_v60 }
 0xfe8   :  { %v4631_v62 = vsub.f32 %v4629_v60, %v4630_v61 }
 0xfea   :  { %v4632_v63 = vand.u32 4294901760, %v4631_v62 }
 0xfec   :  { %8788 = vmatmul.mubr.f32.vlgmr.msra.gmra.mrb[10].mxu1 %v4632_v63 }
 0xfed   :  { %9244 = vmatpush3.bf16.msra.mxu1 %v9895_v55  ;;  %8794 = vmatprep.mubr.msk.f32.mxu1 %vm9750_vm1, %v9751_v21 }
 0xfee   :  { %9245 = vmatprep.subr.bf16.mxu1 %v9749_v20 }
 0xff4   :  { %8795 = vmatmul.mubr.f32.vlgmr.msra.gmra.mrb[10].mxu1 %v4628_v59 }
 0xff5   :  { %9247 = vmatpush3.bf16.msra.mxu1 %v9903_v56  ;;  %8801 = vmatprep.mubr.msk.f32.mxu1 %vm9750_vm1, %v9751_v21 }
 0xff6   :  { %9248 = vmatprep.subr.bf16.mxu1 %v9749_v20 }
 0xffc   :  { %8802 = vmatmul.mubr.f32.vlgmr.msra.gmra.mrb[10].mxu1 %v4629_v60 }
 0xffd   :  { %9250 = vmatpush3.bf16.msra.mxu1 %v9886_v52  ;;  %8808 = vmatprep.mubr.msk.f32.mxu1 %vm9750_vm1, %v9751_v21 }
 0xffe   :  { %9251 = vmatprep.subr.bf16.mxu1 %v9749_v20 }
0x1004   :  { %8809 = vmatmul.mubr.f32.vlgmr.msra.gmra.mrb[10].mxu1 %v4630_v61 }
0x1005   :  { %9253 = vmatpush3.bf16.msra.mxu1 %v9915_v57  ;;  %8815 = vmatprep.mubr.msk.f32.mxu1 %vm9750_vm1, %v9751_v21 }
0x1006   :  { %9254 = vmatprep.subr.bf16.mxu1 %v9749_v20 }
0x100c   :  { %8816 = vmatmul.mubr.f32.vlgmr.msra.gmra.mrb[10].mxu1 %v4628_v59 }
0x100d   :  { %9256 = vmatpush3.bf16.msra.mxu1 %v9886_v52  ;;  %8822 = vmatprep.mubr.msk.f32.mxu1 %vm9750_vm1, %v9751_v21 }
0x100e   :  { %9275 = vmatprep.subr.bf16.mxu1 %v9749_v20 }
0x1014   :  { %8823 = vmatmul.mubr.f32.vlgmr.msra.gmra.mrb[10].mxu1 %v4628_v59 }
0x1015   :  { %9277 = vmatpush3.bf16.msra.mxu1 %v9886_v52  ;;  %8871 = vmatprep.mubr.msk.f32.mxu1 %vm9750_vm1, %v9751_v21 }
0x1016   :  { %9278 = vmatprep.subr.bf16.mxu1 %v9749_v20 }
0x1069   :  { %v4552_v0 = vpop.f32.mrb[8].mxu0 }
0x106a   :  { %v8782_v1 = vpop.f32.mrb[9].mxu0  ;;  %v5060_v6 = vadd.f32 %v5059_v5, %v4552_v0  ;;  %v6048_v5 = vld [vmem:[%s6047_s18] sm:$0x1] }
0x106c   :  { %9602 = vtanh.f32 %v5060_v6  ;;  %v8107_v10 = vmul.f32 -1.442695, %v5060_v6  ;;  %v6050_v6 = vrot.slane %v6048_v5, 7 }
0x106e   :  { %9604 = vpow2.f32 %v8107_v10 }
0x1076   :  { %v9603_v9 = vpop.eup %9602 }
0x1078   :  { %v9605_v12 = vpop.eup %9604 }
0x1079   :  { %v5064_v14 = vadd.f32 1.0, %v9605_v12 }
0x107b   :  { %9606 = vrcp.f32 %v5064_v14 }
0x1085   :  { %v9607_v18 = vpop.eup %9606 }
0x1086   :  { %v5068_v35 = vmul.f32 %v9607_v18, %v10160_v32 }
0x10e7   :  { %v5016_v7 = vpop.f32.mrb[10].mxu1 }
0x10e8   :  { %5021 = vrot.lane.b32.xlu1 %v5016_v7, %s9753_s22  ;;  %v8824_v8 = vpop.f32.mrb[11].mxu1  ;;  %v6045_v7 = vld [vmem:[%s6044_s19] sm:$0x1] }
0x10e9   :  { %v6052_v8 = vsel %vm86_vm0, %v6045_v7, %v6050_v6  ;;  %v7041_v7 = vld [vmem:[%s7040_s24] sm:$0x1] }
0x10ec   :  { %5070 = vrot.lane.b32.xlu1 %v9603_v9, %s9746_s3 }
0x115a   :  { %v5022_v15 = vpop.permute.xlu1 %5021 }
0x115b   :  { %v5024_v16 = vadd.f32 %v5022_v15, %v4552_v0 }
0x115d   :  { %v5025_v17 = vadd.f32 %v5024_v16, %v9939_v11 }
0x115e   :  { %v5071_v22 = vpop.permute.xlu1 %5070 }
0x115f   :  { %9608 = vtanh.f32 %v5025_v17  ;;  %v5073_v23 = vmul.f32 %v9607_v18, %v5071_v22  ;;  %v8104_v26 = vmul.f32 -1.442695, %v5025_v17 }
0x1161   :  { %5075 = vrot.lane.b32.xlu1 %v5073_v23, %s9747_s30  ;;  %9610 = vpow2.f32 %v8104_v26 }
0x1169   :  { %v9609_v24 = vpop.eup %9608 }
0x116a   :  { %5035 = vrot.lane.b32.xlu0 %v9609_v24, %s9746_s3 }
0x116b   :  { %v9611_v27 = vpop.eup %9610 }
0x116c   :  { %v5029_v31 = vadd.f32 1.0, %v9611_v27 }
0x116e   :  { %9612 = vrcp.f32 %v5029_v31 }
0x1178   :  { %v9613_v38 = vpop.eup %9612 }
0x1179   :  { %v5033_v30 = vmul.f32 %v9613_v38, %v10166_v41 }
0x11d3   :  { %v5076_v36 = vpop.permute.xlu1 %5075 }
0x11d4   :  { %v10232_v13 = vadd.f32 %v5076_v36, %v5068_v35 }
0x11d6   :  { %9614 = vtanh.f32 %v10232_v13 }
0x11dc   :  { %v5036_v40 = vpop.permute.xlu0 %5035 }
0x11dd   :  { %v5038_v28 = vmul.f32 %v9613_v38, %v5036_v40 }
0x11df   :  { %5040 = vrot.lane.b32.xlu0 %v5038_v28, %s9747_s30 }
0x11e0   :  { %v9615_v42 = vpop.eup %9614 }
0x11e1   :  { %5081 = vrot.lane.b32.xlu1 %v9615_v42, %s9748_s6 }
0x1251   :  { %v5041_v43 = vpop.permute.xlu0 %5040 }
0x1252   :  { %v10238_v44 = vadd.f32 %v5041_v43, %v5033_v30 }
0x1253   :  { %v5082_v45 = vpop.permute.xlu1 %5081 }
0x1254   :  { %9616 = vtanh.f32 %v10238_v44  ;;  %v5084_v32 = vmul.f32 %v9607_v18, %v5082_v45 }
0x1256   :  { %5086 = vrot.lane.b32.xlu1 %v5084_v32, %s9752_s2 }
0x125e   :  { %v9617_v46 = vpop.eup %9616 }
0x125f   :  { %5046 = vrot.lane.b32.xlu0 %v9617_v46, %s9748_s6 }
0x12c8   :  { %v5087_v39 = vpop.permute.xlu1 %5086 }
0x12c9   :  { %v5088_v37 = vsel %vm116_vm2, %v5087_v39, 0 }
0x12ca   :  { %v5157_v47 = vand.u32 4294901760, %v5088_v37 }
0x12cc   :  { %v5158_v25 = vsub.f32 %v5088_v37, %v5157_v47 }
0x12ce   :  { %v5159_v51 = vand.u32 4294901760, %v5158_v25 }
0x12d0   :  { %v5160_v54 = vsub.f32 %v5158_v25, %v5159_v51 }
0x12d1   :  { %v5047_v41 = vpop.permute.xlu0 %5046 }
0x12d2   :  { %v5161_v58 = vand.u32 4294901760, %v5160_v54  ;;  %v10244_v59 = vmul.f32 %v9613_v38, %v5047_v41 }
0x12d4   :  { %5550 = vrot.lane.b32.xlu0 %v10244_v59, %s9747_s30  ;;  %8830 = vmatmul.mubr.f32.vlgmr.msra.gmra.mrb[10].mxu0 %v5161_v58 }
0x12d5   :  { %9262 = vmatpush3.bf16.msra.mxu0 %v9865_v33  ;;  %8836 = vmatprep.mubr.msk.f32.mxu0 %vm9750_vm1, %v9751_v21 }
0x12d6   :  { %9263 = vmatprep.subr.bf16.mxu0 %v9749_v20 }
0x12dc   :  { %8837 = vmatmul.mubr.f32.vlgmr.msra.gmra.mrb[10].mxu0 %v5157_v47 }
0x12dd   :  { %9265 = vmatpush3.bf16.msra.mxu0 %v9867_v34  ;;  %8843 = vmatprep.mubr.msk.f32.mxu0 %vm9750_vm1, %v9751_v21 }
0x12de   :  { %9266 = vmatprep.subr.bf16.mxu0 %v9749_v20 }
0x12e4   :  { %8844 = vmatmul.mubr.f32.vlgmr.msra.gmra.mrb[10].mxu0 %v5158_v25 }
0x12e5   :  { %9268 = vmatpush3.bf16.msra.mxu0 %v9850_v19  ;;  %8850 = vmatprep.mubr.msk.f32.mxu0 %vm9750_vm1, %v9751_v21 }
0x12e6   :  { %9269 = vmatprep.subr.bf16.mxu0 %v9749_v20 }
0x12ec   :  { %8851 = vmatmul.mubr.f32.vlgmr.msra.gmra.mrb[10].mxu0 %v5159_v51 }
0x12ed   :  { %9271 = vmatpush3.bf16.msra.mxu0 %v9862_v29  ;;  %8857 = vmatprep.mubr.msk.f32.mxu0 %vm9750_vm1, %v9751_v21 }
0x12ee   :  { %9272 = vmatprep.subr.bf16.mxu0 %v9749_v20 }
0x12f4   :  { %8858 = vmatmul.mubr.f32.vlgmr.msra.gmra.mrb[10].mxu0 %v5157_v47 }
0x12f5   :  { %9274 = vmatpush3.bf16.msra.mxu0 %v9850_v19  ;;  %8864 = vmatprep.mubr.msk.f32.mxu0 %vm9750_vm1, %v9751_v21 }
0x12f6   :  { %9293 = vmatprep.subr.bf16.mxu0 %v9749_v20 }
0x12fc   :  { %8865 = vmatmul.mubr.f32.vlgmr.msra.gmra.mrb[10].mxu0 %v5157_v47 }
0x12fd   :  { %9295 = vmatpush3.bf16.msra.mxu0 %v9850_v19  ;;  %8913 = vmatprep.mubr.msk.f32.mxu0 %vm9750_vm1, %v9751_v21 }
0x12fe   :  { %9296 = vmatprep.subr.bf16.mxu0 %v9749_v20 }
0x1346   :  { %v5551_v60 = vpop.permute.xlu0 %5550 }
0x1347   :  { %v5552_v61 = vsel %vm116_vm2, %v5551_v60, 0 }
0x1348   :  { %v5621_v62 = vand.u32 4294901760, %v5552_v61 }
0x134a   :  { %v5622_v63 = vsub.f32 %v5552_v61, %v5621_v62 }
0x134c   :  { %v5623_v0 = vand.u32 4294901760, %v5622_v63 }
0x134e   :  { %v5624_v1 = vsub.f32 %v5622_v63, %v5623_v0 }
0x1350   :  { %v5625_v2 = vand.u32 4294901760, %v5624_v1 }
0x1352   :  { %8872 = vmatmul.mubr.f32.vlgmr.msra.gmra.mrb[12].mxu1 %v5625_v2 }
0x1353   :  { %9280 = vmatpush3.bf16.msra.mxu1 %v9895_v55  ;;  %8878 = vmatprep.mubr.msk.f32.mxu1 %vm9750_vm1, %v9751_v21 }
0x1354   :  { %9281 = vmatprep.subr.bf16.mxu1 %v9749_v20 }
0x135a   :  { %8879 = vmatmul.mubr.f32.vlgmr.msra.gmra.mrb[12].mxu1 %v5621_v62 }
0x135b   :  { %9283 = vmatpush3.bf16.msra.mxu1 %v9903_v56  ;;  %8885 = vmatprep.mubr.msk.f32.mxu1 %vm9750_vm1, %v9751_v21 }
0x135c   :  { %9284 = vmatprep.subr.bf16.mxu1 %v9749_v20 }
0x1362   :  { %8886 = vmatmul.mubr.f32.vlgmr.msra.gmra.mrb[12].mxu1 %v5622_v63 }
0x1363   :  { %9286 = vmatpush3.bf16.msra.mxu1 %v9886_v52  ;;  %8892 = vmatprep.mubr.msk.f32.mxu1 %vm9750_vm1, %v9751_v21 }
0x1364   :  { %9287 = vmatprep.subr.bf16.mxu1 %v9749_v20 }
0x136a   :  { %8893 = vmatmul.mubr.f32.vlgmr.msra.gmra.mrb[12].mxu1 %v5623_v0 }
0x136b   :  { %9289 = vmatpush3.bf16.msra.mxu1 %v9915_v57  ;;  %8899 = vmatprep.mubr.msk.f32.mxu1 %vm9750_vm1, %v9751_v21 }
0x136c   :  { %9290 = vmatprep.subr.bf16.mxu1 %v9749_v20 }
0x1372   :  { %8900 = vmatmul.mubr.f32.vlgmr.msra.gmra.mrb[12].mxu1 %v5621_v62 }
0x1373   :  { %9292 = vmatpush3.bf16.msra.mxu1 %v9886_v52  ;;  %8906 = vmatprep.mubr.msk.f32.mxu1 %vm9750_vm1, %v9751_v21 }
0x1374   :  { %9311 = vmatprep.subr.bf16.mxu1 %v9749_v20 }
0x137a   :  { %8907 = vmatmul.mubr.f32.vlgmr.msra.gmra.mrb[12].mxu1 %v5621_v62 }
0x137b   :  { %9313 = vmatpush3.bf16.msra.mxu1 %v9886_v52  ;;  %8955 = vmatprep.mubr.msk.f32.mxu1 %vm9750_vm1, %v9751_v21 }
0x137c   :  { %9314 = vmatprep.subr.bf16.mxu1 %v9749_v20 }
0x13cf   :  { %v5545_v3 = vpop.f32.mrb[10].mxu0 }
0x13d0   :  { %v8866_v4 = vpop.f32.mrb[11].mxu0  ;;  %v6053_v9 = vadd.f32 %v6052_v8, %v5545_v3  ;;  %v7043_v8 = vrot.slane %v7041_v7, 7 }
0x13d2   :  { %9618 = vtanh.f32 %v6053_v9  ;;  %v8111_v15 = vmul.f32 -1.442695, %v6053_v9  ;;  %v7038_v9 = vld [vmem:[%s7037_s25] sm:$0x1] }
0x13d4   :  { %9620 = vpow2.f32 %v8111_v15 }
0x13dc   :  { %v9619_v14 = vpop.eup %9618 }
0x13de   :  { %v9621_v16 = vpop.eup %9620 }
0x13df   :  { %v6057_v17 = vadd.f32 1.0, %v9621_v16 }
0x13e1   :  { %9622 = vrcp.f32 %v6057_v17 }
0x13eb   :  { %v9623_v24 = vpop.eup %9622 }
0x13ec   :  { %v6061_v40 = vmul.f32 %v9623_v24, %v10232_v13 }
0x144d   :  { %v6009_v10 = vpop.f32.mrb[12].mxu1 }
0x144e   :  { %6014 = vrot.lane.b32.xlu0 %v6009_v10, %s9753_s22  ;;  %v8908_v12 = vpop.f32.mrb[13].mxu1  ;;  %v7045_v10 = vsel %vm86_vm0, %v7038_v9, %v7043_v8 }
0x1452   :  { %6063 = vrot.lane.b32.xlu0 %v9619_v14, %s9746_s3 }
0x14c0   :  { %v6015_v18 = vpop.permute.xlu0 %6014 }
0x14c1   :  { %v6017_v22 = vadd.f32 %v6015_v18, %v5545_v3 }
0x14c3   :  { %v6018_v23 = vadd.f32 %v6017_v22, %v9939_v11 }
0x14c4   :  { %v6064_v26 = vpop.permute.xlu0 %6063 }
0x14c5   :  { %9624 = vtanh.f32 %v6018_v23  ;;  %v6066_v27 = vmul.f32 %v9623_v24, %v6064_v26  ;;  %v8108_v35 = vmul.f32 -1.442695, %v6018_v23 }
0x14c7   :  { %6068 = vrot.lane.b32.xlu0 %v6066_v27, %s9747_s30  ;;  %9626 = vpow2.f32 %v8108_v35 }
0x14cf   :  { %v9625_v31 = vpop.eup %9624 }
0x14d0   :  { %6028 = vrot.lane.b32.xlu1 %v9625_v31, %s9746_s3 }
0x14d1   :  { %v9627_v36 = vpop.eup %9626 }
0x14d2   :  { %v6022_v38 = vadd.f32 1.0, %v9627_v36 }
0x14d4   :  { %9628 = vrcp.f32 %v6022_v38 }
0x14de   :  { %v9629_v30 = vpop.eup %9628 }
0x14df   :  { %v6026_v46 = vmul.f32 %v9629_v30, %v10238_v44 }
0x1539   :  { %v6069_v28 = vpop.permute.xlu0 %6068 }
0x153a   :  { %v10304_v42 = vadd.f32 %v6069_v28, %v6061_v40 }
0x153c   :  { %9630 = vtanh.f32 %v10304_v42 }
0x1542   :  { %v6029_v43 = vpop.permute.xlu1 %6028 }
0x1543   :  { %v6031_v45 = vmul.f32 %v9629_v30, %v6029_v43 }
0x1545   :  { %6033 = vrot.lane.b32.xlu1 %v6031_v45, %s9747_s30 }
0x1546   :  { %v9631_v32 = vpop.eup %9630 }
0x1547   :  { %6074 = vrot.lane.b32.xlu0 %v9631_v32, %s9748_s6 }
0x15b7   :  { %v6034_v39 = vpop.permute.xlu1 %6033 }
0x15b8   :  { %v10310_v37 = vadd.f32 %v6034_v39, %v6026_v46 }
0x15b9   :  { %v6075_v47 = vpop.permute.xlu0 %6074 }
0x15ba   :  { %9632 = vtanh.f32 %v10310_v37  ;;  %v6077_v13 = vmul.f32 %v9623_v24, %v6075_v47 }
0x15bc   :  { %6079 = vrot.lane.b32.xlu0 %v6077_v13, %s9752_s2 }
0x15c4   :  { %v9633_v25 = vpop.eup %9632 }
0x15c5   :  { %6039 = vrot.lane.b32.xlu1 %v9633_v25, %s9748_s6 }
0x162e   :  { %v6080_v51 = vpop.permute.xlu0 %6079 }
0x162f   :  { %v6081_v54 = vsel %vm116_vm2, %v6080_v51, 0 }
0x1630   :  { %v6150_v41 = vand.u32 4294901760, %v6081_v54 }
0x1632   :  { %v6151_v58 = vsub.f32 %v6081_v54, %v6150_v41 }
0x1634   :  { %v6152_v60 = vand.u32 4294901760, %v6151_v58 }
0x1636   :  { %v6153_v61 = vsub.f32 %v6151_v58, %v6152_v60 }
0x1637   :  { %v6040_v44 = vpop.permute.xlu1 %6039 }
0x1638   :  { %v6154_v62 = vand.u32 4294901760, %v6153_v61  ;;  %v10316_v63 = vmul.f32 %v9629_v30, %v6040_v44 }
0x163a   :  { %6543 = vrot.lane.b32.xlu1 %v10316_v63, %s9747_s30  ;;  %8914 = vmatmul.mubr.f32.vlgmr.msra.gmra.mrb[12].mxu0 %v6154_v62 }
0x163b   :  { %9298 = vmatpush3.bf16.msra.mxu0 %v9865_v33  ;;  %8920 = vmatprep.mubr.msk.f32.mxu0 %vm9750_vm1, %v9751_v21 }
0x163c   :  { %9299 = vmatprep.subr.bf16.mxu0 %v9749_v20 }
0x1642   :  { %8921 = vmatmul.mubr.f32.vlgmr.msra.gmra.mrb[12].mxu0 %v6150_v41 }
0x1643   :  { %9301 = vmatpush3.bf16.msra.mxu0 %v9867_v34  ;;  %8927 = vmatprep.mubr.msk.f32.mxu0 %vm9750_vm1, %v9751_v21 }
0x1644   :  { %9302 = vmatprep.subr.bf16.mxu0 %v9749_v20 }
0x164a   :  { %8928 = vmatmul.mubr.f32.vlgmr.msra.gmra.mrb[12].mxu0 %v6151_v58 }
0x164b   :  { %9304 = vmatpush3.bf16.msra.mxu0 %v9850_v19  ;;  %8934 = vmatprep.mubr.msk.f32.mxu0 %vm9750_vm1, %v9751_v21 }
0x164c   :  { %9305 = vmatprep.subr.bf16.mxu0 %v9749_v20 }
0x1652   :  { %8935 = vmatmul.mubr.f32.vlgmr.msra.gmra.mrb[12].mxu0 %v6152_v60 }
0x1653   :  { %9307 = vmatpush3.bf16.msra.mxu0 %v9862_v29  ;;  %8941 = vmatprep.mubr.msk.f32.mxu0 %vm9750_vm1, %v9751_v21 }
0x1654   :  { %9308 = vmatprep.subr.bf16.mxu0 %v9749_v20 }
0x165a   :  { %8942 = vmatmul.mubr.f32.vlgmr.msra.gmra.mrb[12].mxu0 %v6150_v41 }
0x165b   :  { %9310 = vmatpush3.bf16.msra.mxu0 %v9850_v19  ;;  %8948 = vmatprep.mubr.msk.f32.mxu0 %vm9750_vm1, %v9751_v21 }
0x165c   :  { %9329 = vmatprep.subr.bf16.mxu0 %v9749_v20 }
0x1662   :  { %8949 = vmatmul.mubr.f32.vlgmr.msra.gmra.mrb[12].mxu0 %v6150_v41 }
0x1663   :  { %9331 = vmatpush3.bf16.msra.mxu0 %v9850_v19  ;;  %8997 = vmatprep.mubr.msk.f32.mxu0 %vm9750_vm1, %v9751_v21 }
0x1664   :  { %9335 = vmatprep.subr.bf16.mxu0 %v9749_v20 }
0x16ac   :  { %v6544_v0 = vpop.permute.xlu1 %6543 }
0x16ad   :  { %v6545_v1 = vsel %vm116_vm2, %v6544_v0, 0 }
0x16ae   :  { %v6614_v2 = vand.u32 4294901760, %v6545_v1 }
0x16b0   :  { %v6615_v3 = vsub.f32 %v6545_v1, %v6614_v2 }
0x16b2   :  { %v6616_v4 = vand.u32 4294901760, %v6615_v3 }
0x16b4   :  { %v6617_v5 = vsub.f32 %v6615_v3, %v6616_v4 }
0x16b6   :  { %v6618_v6 = vand.u32 4294901760, %v6617_v5 }
0x16b8   :  { %8956 = vmatmul.mubr.f32.vlgmr.msra.gmra.mrb[14].mxu1 %v6618_v6 }
0x16b9   :  { %9316 = vmatpush3.bf16.msra.mxu1 %v9895_v55  ;;  %8962 = vmatprep.mubr.msk.f32.mxu1 %vm9750_vm1, %v9751_v21 }
0x16ba   :  { %9317 = vmatprep.subr.bf16.mxu1 %v9749_v20 }
0x16c0   :  { %8963 = vmatmul.mubr.f32.vlgmr.msra.gmra.mrb[14].mxu1 %v6614_v2 }
0x16c1   :  { %9319 = vmatpush3.bf16.msra.mxu1 %v9903_v56  ;;  %8969 = vmatprep.mubr.msk.f32.mxu1 %vm9750_vm1, %v9751_v21 }
0x16c2   :  { %9320 = vmatprep.subr.bf16.mxu1 %v9749_v20 }
0x16c8   :  { %8970 = vmatmul.mubr.f32.vlgmr.msra.gmra.mrb[14].mxu1 %v6615_v3 }
0x16c9   :  { %9322 = vmatpush3.bf16.msra.mxu1 %v9886_v52  ;;  %8976 = vmatprep.mubr.msk.f32.mxu1 %vm9750_vm1, %v9751_v21 }
0x16ca   :  { %9323 = vmatprep.subr.bf16.mxu1 %v9749_v20 }
0x16d0   :  { %8977 = vmatmul.mubr.f32.vlgmr.msra.gmra.mrb[14].mxu1 %v6616_v4 }
0x16d1   :  { %9325 = vmatpush3.bf16.msra.mxu1 %v9915_v57  ;;  %8983 = vmatprep.mubr.msk.f32.mxu1 %vm9750_vm1, %v9751_v21 }
0x16d2   :  { %9326 = vmatprep.subr.bf16.mxu1 %v9749_v20 }
0x16d8   :  { %8984 = vmatmul.mubr.f32.vlgmr.msra.gmra.mrb[14].mxu1 %v6614_v2 }
0x16d9   :  { %9328 = vmatpush3.bf16.msra.mxu1 %v9886_v52  ;;  %8990 = vmatprep.mubr.msk.f32.mxu1 %vm9750_vm1, %v9751_v21 }
0x16da   :  { %9332 = vmatprep.subr.bf16.mxu1 %v9749_v20 }
0x16e0   :  { %8991 = vmatmul.mubr.f32.vlgmr.msra.gmra.mrb[14].mxu1 %v6614_v2 }
0x16e1   :  { %9334 = vmatpush3.bf16.msra.mxu1 %v9865_v33  ;;  %9004 = vmatprep.mubr.msk.f32.mxu1 %vm9750_vm1, %v9751_v21 }
0x16e2   :  { %9338 = vmatprep.subr.bf16.mxu1 %v9749_v20 }
0x1735   :  { %v6538_v12 = vpop.f32.mrb[12].mxu0 }
0x1736   :  { %v7046_v14 = vadd.f32 %v7045_v10, %v6538_v12  ;;  %v8950_v15 = vpop.f32.mrb[13].mxu0 }
0x1738   :  { %9634 = vtanh.f32 %v7046_v14  ;;  %v8115_v33 = vmul.f32 -1.442695, %v7046_v14 }
0x173a   :  { %9636 = vpow2.f32 %v8115_v33 }
0x1742   :  { %v9635_v16 = vpop.eup %9634 }
0x1743   :  { %7056 = vrot.lane.b32.xlu0 %v9635_v16, %s9746_s3 }
0x1744   :  { %v9637_v17 = vpop.eup %9636 }
0x1745   :  { %v7050_v18 = vadd.f32 1.0, %v9637_v17 }
0x1747   :  { %9638 = vrcp.f32 %v7050_v18 }
0x1751   :  { %v9639_v24 = vpop.eup %9638 }
0x1752   :  { %v7054_v38 = vmul.f32 %v9639_v24, %v10304_v42 }
0x17b3   :  { %v7002_v22 = vpop.f32.mrb[14].mxu1 }
0x17b4   :  { %7007 = vrot.lane.b32.xlu1 %v7002_v22, %s9753_s22  ;;  %v8992_v23 = vpop.f32.mrb[15].mxu1 }
0x17b5   :  { %v7057_v26 = vpop.permute.xlu0 %7056 }
0x17b6   :  { %v7059_v27 = vmul.f32 %v9639_v24, %v7057_v26 }
0x17b8   :  { %7061 = vrot.lane.b32.xlu0 %v7059_v27, %s9747_s30 }
0x1826   :  { %v7008_v31 = vpop.permute.xlu1 %7007 }
0x1827   :  { %v7010_v35 = vadd.f32 %v7008_v31, %v6538_v12 }
0x1829   :  { %v7011_v36 = vadd.f32 %v7010_v35, %v9939_v11 }
0x182a   :  { %v7062_v40 = vpop.permute.xlu0 %7061 }
0x182b   :  { %9640 = vtanh.f32 %v7011_v36  ;;  %v7064_v28 = vadd.f32 %v7062_v40, %v7054_v38  ;;  %v8112_v45 = vmul.f32 -1.442695, %v7011_v36 }
0x182d   :  { %9642 = vtanh.f32 %v7064_v28 }
0x182e   :  { %9644 = vpow2.f32 %v8112_v45 }
0x1835   :  { %v9641_v30 = vpop.eup %9640 }
0x1836   :  { %7021 = vrot.lane.b32.xlu1 %v9641_v30, %s9746_s3 }
0x1837   :  { %v9643_v43 = vpop.eup %9642 }
0x1838   :  { %7067 = vrot.lane.b32.xlu0 %v9643_v43, %s9748_s6  ;;  %v9645_v32 = vpop.eup %9644 }
0x1839   :  { %v7015_v46 = vadd.f32 1.0, %v9645_v32 }
0x183b   :  { %9646 = vrcp.f32 %v7015_v46 }
0x1845   :  { %v9647_v39 = vpop.eup %9646 }
0x1846   :  { %v7019_v51 = vmul.f32 %v9647_v39, %v10310_v37 }
0x18a8   :  { %v7022_v47 = vpop.permute.xlu1 %7021 }
0x18a9   :  { %v7024_v13 = vmul.f32 %v9647_v39, %v7022_v47 }
0x18aa   :  { %v7068_v25 = vpop.permute.xlu0 %7067 }
0x18ab   :  { %7026 = vrot.lane.b32.xlu1 %v7024_v13, %s9747_s30  ;;  %v7070_v42 = vmul.f32 %v9639_v24, %v7068_v25 }
0x18ad   :  { %7072 = vrot.lane.b32.xlu0 %v7070_v42, %s9752_s2 }
0x191d   :  { %v7027_v54 = vpop.permute.xlu1 %7026 }
0x191e   :  { %v10380_v41 = vadd.f32 %v7027_v54, %v7019_v51 }
0x191f   :  { %v7073_v58 = vpop.permute.xlu0 %7072 }
0x1920   :  { %9648 = vtanh.f32 %v10380_v41  ;;  %v7074_v60 = vsel %vm116_vm2, %v7073_v58, 0 }
0x1921   :  { %v7143_v61 = vand.u32 4294901760, %v7074_v60 }
0x1923   :  { %v7144_v44 = vsub.f32 %v7074_v60, %v7143_v61  ;;  %9005 = vmatmul.mubr.f32.vlgmr.msra.gmra.mrb[16].mxu1 %v7143_v61 }
0x1924   :  { %9340 = vmatpush3.bf16.msra.mxu1 %v9850_v19  ;;  %9018 = vmatprep.mubr.msk.f32.mxu1 %vm9750_vm1, %v9751_v21 }
0x1925   :  { %v7145_v62 = vand.u32 4294901760, %v7144_v44  ;;  %9344 = vmatprep.subr.bf16.mxu1 %v9749_v20 }
0x1927   :  { %v7146_v37 = vsub.f32 %v7144_v44, %v7145_v62  ;;  %9019 = vmatmul.mubr.f32.vlgmr.msra.gmra.mrb[18].mxu1 %v7145_v62 }
0x1928   :  { %9346 = vmatpush3.bf16.msra.mxu1 %v9850_v19  ;;  %9032 = vmatprep.mubr.msk.f32.mxu1 %vm9750_vm1, %v9751_v21 }
0x1929   :  { %v7147_v1 = vand.u32 4294901760, %v7146_v37 }
0x192a   :  { %v9649_v0 = vpop.eup %9648 }
0x192b   :  { %7032 = vrot.lane.b32.xlu1 %v9649_v0, %s9748_s6  ;;  %8998 = vmatmul.mubr.f32.vlgmr.msra.gmra.mrb[14].mxu0 %v7147_v1 }
0x192c   :  { %9033 = vmatmul.mubr.f32.vlgmr.msra.gmra.mrb[20].mxu1 %v7143_v61  ;;  %9337 = vmatpush3.bf16.msra.mxu0 %v9867_v34 }
0x192d   :  { %9011 = vmatprep.mubr.msk.f32.mxu0 %vm9750_vm1, %v9751_v21  ;;  %9341 = vmatprep.subr.bf16.mxu0 %v9749_v20 }
0x192f   :  { %9012 = vmatmul.mubr.f32.vlgmr.msra.gmra.mrb[16].mxu0 %v7144_v44 }
0x1930   :  { %9343 = vmatpush3.bf16.msra.mxu0 %v9862_v29  ;;  %9025 = vmatprep.mubr.msk.f32.mxu0 %vm9750_vm1, %v9751_v21 }
0x1931   :  { %9347 = vmatprep.subr.bf16.mxu0 %v9749_v20 }
0x1933   :  { %9026 = vmatmul.mubr.f32.vlgmr.msra.gmra.mrb[18].mxu0 %v7143_v61 }
0x1934   :  { %9349 = vmatpush3.bf16.msra.mxu0 %v9886_v52  ;;  %9039 = vmatprep.mubr.msk.f32.mxu0 %vm9750_vm1, %v9751_v21 }
0x1935   :  { %9350 = vmatprep.subr.bf16.mxu0 %v9749_v20 }
0x199d   :  { %v7033_v19 = vpop.permute.xlu1 %7032 }
0x199e   :  { %v10404_v34 = vmul.f32 %v9647_v39, %v7033_v19 }
0x19a0   :  { %7536 = vrot.lane.b32.xlu1 %v10404_v34, %s9747_s30 }
0x19f6   :  { %v7230_v29 = vpop.f32.mrb[16].mxu1 }
0x19f7   :  { %v9006_v2 = vpop.f32.mrb[17].mxu1 }
0x19fa   :  { %v7381_v3 = vpop.f32.mrb[18].mxu1 }
0x19fb   :  { %v9020_v4 = vpop.f32.mrb[19].mxu1 }
0x19fe   :  { %v7149_v5 = vpop.f32.mrb[14].mxu0 }
0x19ff   :  { %v7531_v6 = vpop.f32.mrb[20].mxu1  ;;  %v7231_v7 = vadd.f32 %v7230_v29, %v7149_v5  ;;  %v8999_v8 = vpop.f32.mrb[15].mxu0 }
0x1a00   :  { %v9034_v9 = vpop.f32.mrb[21].mxu1 }
0x1a02   :  { %v7306_v10 = vpop.f32.mrb[16].mxu0 }
0x1a03   :  { %v7307_v12 = vadd.f32 %v7306_v10, %v7231_v7  ;;  %v9013_v14 = vpop.f32.mrb[17].mxu0 }
0x1a05   :  { %v7382_v15 = vadd.f32 %v7381_v3, %v7307_v12 }
0x1a06   :  { %v7458_v16 = vpop.f32.mrb[18].mxu0 }
0x1a07   :  { %v7459_v33 = vadd.f32 %v7458_v16, %v7382_v15  ;;  %v9027_v17 = vpop.f32.mrb[19].mxu0 }
0x1a09   :  { %v7532_v18 = vadd.f32 %v7531_v6, %v7459_v33 }
0x1a12   :  { %v7537_v22 = vpop.permute.xlu1 %7536 }
0x1a13   :  { %v7538_v23 = vsel %vm116_vm2, %v7537_v22, 0 }
0x1a14   :  { %v7607_v24 = vand.u32 4294901760, %v7538_v23 }
0x1a16   :  { %v7608_v26 = vsub.f32 %v7538_v23, %v7607_v24 }
0x1a18   :  { %v7609_v27 = vand.u32 4294901760, %v7608_v26 }
0x1a1a   :  { %v7610_v31 = vsub.f32 %v7608_v26, %v7609_v27 }
0x1a1c   :  { %v7611_v35 = vand.u32 4294901760, %v7610_v31 }
0x1a1e   :  { %9040 = vmatmul.mubr.f32.vlgmr.msra.gmra.mrb[20].mxu0 %v7611_v35 }
0x1a1f   :  { %9352 = vmatpush3.bf16.msra.mxu0 %v9895_v55  ;;  %9046 = vmatprep.mubr.msk.f32.mxu0 %vm9750_vm1, %v9751_v21 }
0x1a20   :  { %9353 = vmatprep.subr.bf16.mxu0 %v9749_v20 }
0x1a26   :  { %9047 = vmatmul.mubr.f32.vlgmr.msra.gmra.mrb[20].mxu0 %v7607_v24 }
0x1a27   :  { %9355 = vmatpush3.bf16.msra.mxu0 %v9903_v56  ;;  %9053 = vmatprep.mubr.msk.f32.mxu0 %vm9750_vm1, %v9751_v21 }
0x1a28   :  { %9356 = vmatprep.subr.bf16.mxu0 %v9749_v20 }
0x1a2e   :  { %9054 = vmatmul.mubr.f32.vlgmr.msra.gmra.mrb[20].mxu0 %v7608_v26 }
0x1a2f   :  { %9358 = vmatpush3.bf16.msra.mxu0 %v9886_v52  ;;  %9060 = vmatprep.mubr.msk.f32.mxu0 %vm9750_vm1, %v9751_v21 }
0x1a30   :  { %9359 = vmatprep.subr.bf16.mxu0 %v9749_v20 }
0x1a36   :  { %9061 = vmatmul.mubr.f32.vlgmr.msra.gmra.mrb[20].mxu0 %v7609_v27 }
0x1a37   :  { %9361 = vmatpush3.bf16.msra.mxu0 %v9915_v57  ;;  %9067 = vmatprep.mubr.msk.f32.mxu0 %vm9750_vm1, %v9751_v21 }
0x1a38   :  { %9362 = vmatprep.subr.bf16.mxu0 %v9749_v20 }
0x1a3e   :  { %9068 = vmatmul.mubr.f32.vlgmr.msra.gmra.mrb[20].mxu0 %v7607_v24 }
0x1a3f   :  { %9364 = vmatpush3.bf16.msra.mxu0 %v9886_v52  ;;  %9074 = vmatprep.mubr.msk.f32.mxu0 %vm9750_vm1, %v9751_v21 }
0x1a46   :  { %9075 = vmatmul.mubr.f32.vlgmr.msra.gmra.mrb[20].mxu0 %v7607_v24 }
0x1b19   :  { %v7995_v55 = vpop.f32.mrb[20].mxu0 }
0x1b1a   :  { %8000 = vrot.lane.b32.xlu0 %v7995_v55, %s9753_s22  ;;  %v9076_v56 = vpop.f32.mrb[21].mxu0 }
0x1b8c   :  { %v8001_v36 = vpop.permute.xlu0 %8000 }
0x1b8d   :  { %v8003_v38 = vadd.f32 %v8001_v36, %v7532_v18 }
0x1b8f   :  { %v8004_v57 = vadd.f32 %v8003_v38, %v9939_v11 }
0x1b91   :  { %9650 = vtanh.f32 %v8004_v57  ;;  %v8116_v20 = vmul.f32 -1.442695, %v8004_v57 }
0x1b93   :  { %9652 = vpow2.f32 %v8116_v20 }
0x1b9b   :  { %v9651_v40 = vpop.eup %9650 }
0x1b9c   :  { %8014 = vrot.lane.b32.xlu1 %v9651_v40, %s9746_s3 }
0x1b9d   :  { %v9653_v21 = vpop.eup %9652 }
0x1b9e   :  { %v8008_v52 = vadd.f32 1.0, %v9653_v21 }
0x1ba0   :  { %8030 = vrot.lane.b32.xlu1 %v10028_v48, %s9748_s6  ;;  %9654 = vrcp.f32 %v8008_v52 }
0x1ba4   :  { %8036 = vrot.lane.b32.xlu1 %v10172_v53, %s9753_s22  ;;  %s9755_s22 = smov 112  }
0x1baa   :  { %v9655_v28 = vpop.eup %9654 }
0x1bab   :  { %v8012_v11 = vmul.f32 %v9655_v28, %v10380_v41 }
0x1c0e   :  { %v8015_v30 = vpop.permute.xlu1 %8014 }
0x1c0f   :  { %v8017_v43 = vmul.f32 %v9655_v28, %v8015_v30 }
0x1c11   :  { %8019 = vrot.lane.b32.xlu0 %v8017_v43, %s9747_s30 }
0x1c12   :  { %v8031_v46 = vpop.permute.xlu1 %8030 }
0x1c15   :  { %8033 = vrot.lane.b32.xlu0 %v10100_v49, %s9754_s26 }
0x1c16   :  { %v8037_v39 = vpop.permute.xlu1 %8036 }
0x1c19   :  { %8039 = vrot.lane.b32.xlu0 %v10244_v59, %s9752_s2  ;;  %v8048_v59 = vsel %vm116_vm2, %v9981_v50, %v8031_v46 }
0x1c1d   :  { %8042 = vrot.lane.b32.xlu0 %v10316_v63, %s9746_s3 }
0x1c83   :  { %v8020_v48 = vpop.permute.xlu0 %8019 }
0x1c84   :  { %v8022_v53 = vadd.f32 %v8020_v48, %v8012_v11 }
0x1c86   :  { %9656 = vtanh.f32 %v8022_v53 }
0x1c87   :  { %v8034_v32 = vpop.permute.xlu0 %8033 }
0x1c88   :  { %v8050_v63 = vsel %vm8049_vm3, %v8048_v59, %v8034_v32 }
0x1c89   :  { %v8052_v25 = vsel %vm8051_vm4, %v8050_v63, %v8037_v39 }
0x1c8b   :  { %v8040_v49 = vpop.permute.xlu0 %8039 }
0x1c8c   :  { %v8054_v42 = vsel %vm8053_vm5, %v8052_v25, %v8040_v49 }
0x1c8f   :  { %v8043_v13 = vpop.permute.xlu0 %8042 }
0x1c90   :  { %v9657_v45 = vpop.eup %9656  ;;  %v8056_v51 = vsel %vm8055_vm6, %v8054_v42, %v8043_v13 }
0x1c91   :  { %8025 = vrot.lane.b32.xlu1 %v9657_v45, %s9748_s6 }
0x1c95   :  { %8045 = vrot.lane.b32.xlu1 %v10404_v34, %s9755_s22 }
0x1d03   :  { %v8026_v47 = vpop.permute.xlu1 %8025 }
0x1d04   :  { %v8028_v54 = vmul.f32 %v9655_v28, %v8026_v47 }
0x1d07   :  { %v8046_v41 = vpop.permute.xlu1 %8045 }
0x1d08   :  { %v8058_v58 = vsel %vm8057_vm7, %v8056_v51, %v8046_v41 }
0x1d09   :  { %v8060_v60 = vsel %vm8059_vm8, %v8058_v58, %v8028_v54 }
0x1d0a   :  { %8061 = vst [vmem:[%s10454_s5] sm:$0x3] %v8060_v60 }
0x1d0b   :  { %8066 = vsyncpa [#allocation3], 1 }
0x1d0c   :  { %8067 = vsyncpa [#allocation7], 1 }
0x1d0d   :  { %8068 = vsyncpa [#allocation4], 1 }

</bundles_post_ra>
